<compile_context>
chip_gen: v5e
topology: v5e:2x2
jax: 0.10.0
libtpu: 0.0.40
codegen_flags: <defaults>
</compile_context>

<pallas_src>
import functools

import jax
import jax.numpy as jnp
from jax import lax
from jax.experimental import pallas as pl
from jax.experimental.pallas import tpu as pltpu

D_IN = 2      # real input features
H = 32        # hidden width
D_PAD = 8     # padded input feature rows per group (4x less than H)
CHUNK = 128   # lane chunk processed fully in vregs inside the kernel


def _mlp_kernel(x_ref, w1_ref, w23_ref, w4_ref, b_ref, o_ref, *, n_chunks):
    # x_ref : [G*8,  tile_l] bf16   group-packed, zero-padded inputs
    # w1_ref: [G*32, G*8   ] bf16   block-diag fc1 (in-dim padded 2 -> 8)
    # w23_ref:[2, G*32, G*32] bf16  block-diag fc2 / fc3
    # w4_ref: [8,  G*32    ] bf16   row g = fc4 weights for group g
    # b_ref : [G*32, 4     ] f32    cols 0..2 = tiled b1..b3, [0,3] = b4
    # o_ref : [8,  tile_l  ] f32    row g = sigmoid output of group g
    def chunk_body(c, carry):
        off = pl.multiple_of(c * CHUNK, CHUNK)
        h = x_ref[:, pl.ds(off, CHUNK)]                       # bf16 [G*8, CHUNK]

        # fc1: block-diag [G*32, G*8] @ [G*8, CHUNK]  (MXU, f32 accumulate)
        a = jnp.dot(w1_ref[...], h, preferred_element_type=jnp.float32)
        a = jnp.maximum(a + b_ref[:, 0:1], 0.0)               # f32 VPU
        h = a.astype(jnp.bfloat16)

        # fc2, fc3: block-diag [G*32, G*32]
        for layer in range(2):
            a = jnp.dot(w23_ref[layer], h, preferred_element_type=jnp.float32)
            a = jnp.maximum(a + b_ref[:, layer + 1:layer + 2], 0.0)
            h = a.astype(jnp.bfloat16)

        # fc4: [8, G*32] @ [G*32, CHUNK] -> one logit row per group
        z = jnp.dot(w4_ref[...], h, preferred_element_type=jnp.float32)
        z = z + b_ref[0:1, 3:4]

        # numerically stable sigmoid: EUP exp + EUP approx reciprocal
        e = jnp.exp(-jnp.abs(z))                              # <= 1, no overflow
        r = pl.reciprocal(1.0 + e, approx=True)
        sig = jnp.where(z >= 0.0, r, e * r)
        o_ref[:, pl.ds(off, CHUNK)] = sig.astype(o_ref.dtype)
        return carry

    lax.fori_loop(0, n_chunks, chunk_body, None, unroll=True)


def spirals3_mlp_forward(x, params, *, groups=8, max_tile_lanes=1024):
    """Fused forward pass of Spirals3MLPNet.

    x: [B, 2] float32.  params: PyTorch-native shapes (w: [out, in], b: [out]).
    groups: independent batch groups packed along sublanes with block-diagonal
            weights.  8 fills the 256-wide v6e/v7x MXU; use 4 on v5e.
    """
    B, d_in = x.shape
    assert d_in == D_IN
    G = groups
    GH = G * H
    GD = G * D_PAD

    # ---- tile geometry (fixed lane tile; n_tiles grows with B) ------------
    per_group = int(pl.cdiv(B, G))
    tile_l = int(min(max_tile_lanes,
                     max(CHUNK, pl.next_power_of_2(per_group))))
    n_tiles = int(pl.cdiv(B, G * tile_l))
    L = n_tiles * tile_l          # lanes total
    cap = G * L                   # padded sample capacity

    # ---- pack inputs: sample s -> (tile i, group g, lane l), bf16, 8 rows --
    # s = i*(G*tile_l) + g*tile_l + l
    xp = jnp.zeros((cap, D_PAD), jnp.float32).at[:B, :D_IN].set(
        x.astype(jnp.float32))
    xt = (xp.reshape(n_tiles, G, tile_l, D_PAD)
            .transpose(1, 3, 0, 2)            # (g, d, i, l)
            .reshape(GD, L)
            .astype(jnp.bfloat16))

    # ---- block-diagonal bf16 weights, group-replicated f32 biases ----------
    eye = jnp.eye(G, dtype=jnp.float32)
    w1p = jnp.zeros((H, D_PAD), jnp.float32).at[:, :D_IN].set(params["w1"])
    w1_bd = jnp.kron(eye, w1p).astype(jnp.bfloat16)                 # [GH, GD]
    w23_bd = jnp.stack([jnp.kron(eye, params["w2"]),
                        jnp.kron(eye, params["w3"])]).astype(jnp.bfloat16)
    w4_pk = (jnp.zeros((8, GH), jnp.float32)
               .at[:G, :].set(jnp.kron(eye, params["w4"]))
               .astype(jnp.bfloat16))                                # [8, GH]

    b_stack = jnp.zeros((GH, 4), jnp.float32)
    b_stack = b_stack.at[:, 0].set(jnp.tile(params["b1"], G))
    b_stack = b_stack.at[:, 1].set(jnp.tile(params["b2"], G))
    b_stack = b_stack.at[:, 2].set(jnp.tile(params["b3"], G))
    b_stack = b_stack.at[0, 3].set(params["b4"][0])

    kernel = functools.partial(_mlp_kernel, n_chunks=tile_l // CHUNK)

    out = pl.pallas_call(
        kernel,
        out_shape=jax.ShapeDtypeStruct((8, L), jnp.float32),
        grid_spec=pltpu.PrefetchScalarGridSpec(
            num_scalar_prefetch=0,
            grid=(n_tiles,),
            in_specs=[
                pl.BlockSpec((GD, tile_l), lambda i: (0, i)),
                pl.BlockSpec((GH, GD), lambda i: (0, 0)),
                pl.BlockSpec((2, GH, GH), lambda i: (0, 0, 0)),
                pl.BlockSpec((8, GH), lambda i: (0, 0)),
                pl.BlockSpec((GH, 4), lambda i: (0, 0)),
            ],
            out_specs=pl.BlockSpec((8, tile_l), lambda i: (0, i)),
        ),
        compiler_params=pltpu.CompilerParams(
            dimension_semantics=("parallel",),
        ),
    )(xt, w1_bd, w23_bd, w4_pk, b_stack)

    # ---- unpack [8, L] -> [B, 1] (layout plumbing only, outside kernel) ----
    y = (out[:G]
         .reshape(G, n_tiles, tile_l)
         .transpose(1, 0, 2)
         .reshape(cap)[:B])
    return y[:, None]


def init_params(key):
    """Deterministic init matching nn.Linear (PyTorch-native shapes)."""
    dims = [(32, 2), (32, 32), (32, 32), (1, 32)]   # (out, in)
    params = {}
    for idx, (fan_out, fan_in) in enumerate(dims, start=1):
        key, kw, kb = jax.random.split(key, 3)
        bound = 1.0 / jnp.sqrt(fan_in)
        params[f"w{idx}"] = jax.random.uniform(
            kw, (fan_out, fan_in), jnp.float32, -bound, bound)
        params[f"b{idx}"] = jax.random.uniform(
            kb, (fan_out,), jnp.float32, -bound, bound)
    return params


def _reference_forward(x, params):
    h = jnp.maximum(x @ params["w1"].T + params["b1"], 0.0)
    h = jnp.maximum(h @ params["w2"].T + params["b2"], 0.0)
    h = jnp.maximum(h @ params["w3"].T + params["b3"], 0.0)
    return jax.nn.sigmoid(h @ params["w4"].T + params["b4"])


if __name__ == "__main__":
    key = jax.random.PRNGKey(0)
    kx, kp = jax.random.split(key)

    B = 256  # batch of 2-D spiral points
    x = jax.random.normal(kx, (B, D_IN), jnp.float32)
    params = init_params(kp)

    out = jax.block_until_ready(spirals3_mlp_forward(x, params))
    ref = _reference_forward(x, params)

    assert out.shape == (B, 1)
    # bf16 MXU operands + EUP approximate reciprocal vs an f32 reference:
    # observed error is ~1e-3-5e-3; 2e-2 still catches any packing/layout bug.
    assert jnp.max(jnp.abs(out - ref)) < 2e-2

    print("KERNEL_OK")
</pallas_src>

<mosaic_0001>
module attributes {stable_mosaic.version = 11 : i64} {
  func.func @_mlp_kernel(%arg0: i32, %arg1: memref<64x128xbf16, #tpu.memory_space<vmem>>, %arg2: memref<256x64xbf16, #tpu.memory_space<vmem>>, %arg3: memref<2x256x256xbf16, #tpu.memory_space<vmem>>, %arg4: memref<8x256xbf16, #tpu.memory_space<vmem>>, %arg5: memref<256x4xf32, #tpu.memory_space<vmem>>, %arg6: memref<8x128xf32, #tpu.memory_space<vmem>>) attributes {dimension_semantics = [#tpu.dimension_semantics<parallel>], iteration_bounds = array<i64: 1>, scalar_prefetch = 0 : i64, scratch_operands = 0 : i64, tpu.core_type = #tpu.core_type<tc>, window_params = [{transform_indices = @transform_0, window_bounds = array<i64: 64, 128>}, {pipeline_mode = #tpu.pipeline_mode<synchronous>, transform_indices = @transform_1, window_bounds = array<i64: 256, 64>}, {pipeline_mode = #tpu.pipeline_mode<synchronous>, transform_indices = @transform_2, window_bounds = array<i64: 2, 256, 256>}, {pipeline_mode = #tpu.pipeline_mode<synchronous>, transform_indices = @transform_3, window_bounds = array<i64: 8, 256>}, {pipeline_mode = #tpu.pipeline_mode<synchronous>, transform_indices = @transform_4, window_bounds = array<i64: 256, 4>}, {transform_indices = @transform_5, window_bounds = array<i64: 8, 128>}]} {
    %c0_i32 = arith.constant 0 : i32
    %c128_i32 = arith.constant 128 : i32
    %0 = arith.muli %c0_i32, %c128_i32 : i32
    %1 = tpu.assume_multiple %0, 128 : i32
    %c0 = arith.constant 0 : index
    %2 = arith.index_cast %1 : i32 to index
    %3 = vector.load %arg1[%c0, %2] : memref<64x128xbf16, #tpu.memory_space<vmem>>, vector<64x128xbf16>
    %c0_0 = arith.constant 0 : index
    %c0_1 = arith.constant 0 : index
    %4 = vector.load %arg2[%c0_0, %c0_1] : memref<256x64xbf16, #tpu.memory_space<vmem>>, vector<256x64xbf16>
    %cst = arith.constant dense<0.000000e+00> : vector<256x128xf32>
    %5 = tpu.matmul %4, %3, %cst {dimension_numbers = #tpu.dot_dimension_numbers<[1], [0], [0], [1], [0, 0, 1, 1], [], []>} : vector<256x64xbf16>, vector<64x128xbf16>, vector<256x128xf32> -> vector<256x128xf32>
    %c0_2 = arith.constant 0 : index
    %c0_3 = arith.constant 0 : index
    %6 = vector.load %arg5[%c0_2, %c0_3] : memref<256x4xf32, #tpu.memory_space<vmem>>, vector<256x1xf32>
    %7 = vector.broadcast %6 : vector<256x1xf32> to vector<256x128xf32>
    %8 = arith.addf %5, %7 : vector<256x128xf32>
    %cst_4 = arith.constant 0.000000e+00 : f32
    %9 = vector.broadcast %cst_4 : f32 to vector<256x128xf32>
    %10 = arith.maximumf %8, %9 : vector<256x128xf32>
    %11 = arith.truncf %10 : vector<256x128xf32> to vector<256x128xbf16>
    %c0_5 = arith.constant 0 : index
    %c0_6 = arith.constant 0 : index
    %c0_7 = arith.constant 0 : index
    %12 = vector.load %arg3[%c0_5, %c0_6, %c0_7] : memref<2x256x256xbf16, #tpu.memory_space<vmem>>, vector<1x256x256xbf16>
    %13 = vector.shape_cast %12 : vector<1x256x256xbf16> to vector<256x256xbf16>
    %cst_8 = arith.constant dense<0.000000e+00> : vector<256x128xf32>
    %14 = tpu.matmul %13, %11, %cst_8 {dimension_numbers = #tpu.dot_dimension_numbers<[1], [0], [0], [1], [0, 0, 1, 1], [], []>} : vector<256x256xbf16>, vector<256x128xbf16>, vector<256x128xf32> -> vector<256x128xf32>
    %c0_9 = arith.constant 0 : index
    %c1 = arith.constant 1 : index
    %15 = vector.load %arg5[%c0_9, %c1] : memref<256x4xf32, #tpu.memory_space<vmem>>, vector<256x1xf32>
    %16 = vector.broadcast %15 : vector<256x1xf32> to vector<256x128xf32>
    %17 = arith.addf %14, %16 : vector<256x128xf32>
    %cst_10 = arith.constant 0.000000e+00 : f32
    %18 = vector.broadcast %cst_10 : f32 to vector<256x128xf32>
    %19 = arith.maximumf %17, %18 : vector<256x128xf32>
    %20 = arith.truncf %19 : vector<256x128xf32> to vector<256x128xbf16>
    %c1_11 = arith.constant 1 : index
    %c0_12 = arith.constant 0 : index
    %c0_13 = arith.constant 0 : index
    %21 = vector.load %arg3[%c1_11, %c0_12, %c0_13] : memref<2x256x256xbf16, #tpu.memory_space<vmem>>, vector<1x256x256xbf16>
    %22 = vector.shape_cast %21 : vector<1x256x256xbf16> to vector<256x256xbf16>
    %cst_14 = arith.constant dense<0.000000e+00> : vector<256x128xf32>
    %23 = tpu.matmul %22, %20, %cst_14 {dimension_numbers = #tpu.dot_dimension_numbers<[1], [0], [0], [1], [0, 0, 1, 1], [], []>} : vector<256x256xbf16>, vector<256x128xbf16>, vector<256x128xf32> -> vector<256x128xf32>
    %c0_15 = arith.constant 0 : index
    %c2 = arith.constant 2 : index
    %24 = vector.load %arg5[%c0_15, %c2] : memref<256x4xf32, #tpu.memory_space<vmem>>, vector<256x1xf32>
    %25 = vector.broadcast %24 : vector<256x1xf32> to vector<256x128xf32>
    %26 = arith.addf %23, %25 : vector<256x128xf32>
    %cst_16 = arith.constant 0.000000e+00 : f32
    %27 = vector.broadcast %cst_16 : f32 to vector<256x128xf32>
    %28 = arith.maximumf %26, %27 : vector<256x128xf32>
    %29 = arith.truncf %28 : vector<256x128xf32> to vector<256x128xbf16>
    %c0_17 = arith.constant 0 : index
    %c0_18 = arith.constant 0 : index
    %30 = vector.load %arg4[%c0_17, %c0_18] : memref<8x256xbf16, #tpu.memory_space<vmem>>, vector<8x256xbf16>
    %cst_19 = arith.constant dense<0.000000e+00> : vector<8x128xf32>
    %31 = tpu.matmul %30, %29, %cst_19 {dimension_numbers = #tpu.dot_dimension_numbers<[1], [0], [0], [1], [0, 0, 1, 1], [], []>} : vector<8x256xbf16>, vector<256x128xbf16>, vector<8x128xf32> -> vector<8x128xf32>
    %c0_20 = arith.constant 0 : index
    %c3 = arith.constant 3 : index
    %32 = vector.load %arg5[%c0_20, %c3] : memref<256x4xf32, #tpu.memory_space<vmem>>, vector<1x1xf32>
    %33 = vector.broadcast %32 : vector<1x1xf32> to vector<8x128xf32>
    %34 = arith.addf %31, %33 : vector<8x128xf32>
    %35 = math.absf %34 : vector<8x128xf32>
    %cst_21 = arith.constant 0.000000e+00 : f32
    %36 = vector.broadcast %cst_21 : f32 to vector<8x128xf32>
    %37 = arith.subf %36, %35 : vector<8x128xf32>
    %38 = math.exp %37 : vector<8x128xf32>
    %cst_22 = arith.constant 1.000000e+00 : f32
    %39 = vector.broadcast %cst_22 : f32 to vector<8x128xf32>
    %40 = arith.addf %39, %38 : vector<8x128xf32>
    %41 = tpu.reciprocal %40 {approx = true} : vector<8x128xf32> -> vector<8x128xf32>
    %cst_23 = arith.constant 0.000000e+00 : f32
    %42 = vector.broadcast %cst_23 : f32 to vector<8x128xf32>
    %43 = arith.cmpf oge, %34, %42 : vector<8x128xf32>
    %44 = arith.mulf %38, %41 : vector<8x128xf32>
    %45 = arith.select %43, %41, %44 : vector<8x128xi1>, vector<8x128xf32>
    %c0_24 = arith.constant 0 : index
    %46 = arith.index_cast %1 : i32 to index
    %47 = vector.load %arg6[%c0_24, %46] : memref<8x128xf32, #tpu.memory_space<vmem>>, vector<8x128xf32>
    tpu.vector_store %arg6[%c0_24, %46], %45 {strides = array<i32>} : memref<8x128xf32, #tpu.memory_space<vmem>>, vector<8x128xf32>,
    %c1_i32 = arith.constant 1 : i32
    return
  }
  func.func @transform_0(%arg0: i32) -> (i32, i32) {
    %c0_i32 = arith.constant 0 : i32
    %c0_i32_0 = arith.constant 0 : i32
    return %c0_i32, %arg0 : i32, i32
  }
  func.func @transform_1(%arg0: i32) -> (i32, i32) {
    %c0_i32 = arith.constant 0 : i32
    %c0_i32_0 = arith.constant 0 : i32
    %c0_i32_1 = arith.constant 0 : i32
    return %c0_i32, %c0_i32_0 : i32, i32
  }
  func.func @transform_2(%arg0: i32) -> (i32, i32, i32) {
    %c0_i32 = arith.constant 0 : i32
    %c0_i32_0 = arith.constant 0 : i32
    %c0_i32_1 = arith.constant 0 : i32
    %c0_i32_2 = arith.constant 0 : i32
    return %c0_i32, %c0_i32_0, %c0_i32_1 : i32, i32, i32
  }
  func.func @transform_3(%arg0: i32) -> (i32, i32) {
    %c0_i32 = arith.constant 0 : i32
    %c0_i32_0 = arith.constant 0 : i32
    %c0_i32_1 = arith.constant 0 : i32
    return %c0_i32, %c0_i32_0 : i32, i32
  }
  func.func @transform_4(%arg0: i32) -> (i32, i32) {
    %c0_i32 = arith.constant 0 : i32
    %c0_i32_0 = arith.constant 0 : i32
    %c0_i32_1 = arith.constant 0 : i32
    return %c0_i32, %c0_i32_0 : i32, i32
  }
  func.func @transform_5(%arg0: i32) -> (i32, i32) {
    %c0_i32 = arith.constant 0 : i32
    %c0_i32_0 = arith.constant 0 : i32
    return %c0_i32, %arg0 : i32, i32
  }
}

</mosaic_0001>

<bundles_post_ra>
// kernel: tpu_custom_call.1
= control target key start
LH: loop header
LB: loop body
LE: loop exit
PB: predicated region body
PF: predicated region fallthrough
CT: control target
= control target key end

     0   :  { %10 = vsyncpa [#allocation3], 0  ;;  %s3019_s0 = inlined_call_operand.vmem [shape: bf16[64,128], index: 0, kind: input, shape index: {}]   ;;  %s3020_s1 = inlined_call_operand.vmem [shape: bf16[256,64], index: 1, kind: input, shape index: {}]   ;;  %s3021_s2 = inlined_call_operand.hbm [shape: bf16[2,256,256], index: 2, kind: input, shape index: {}]   ;;  %s3022_s3 = inlined_call_operand.vmem [shape: bf16[8,256], index: 3, kind: input, shape index: {}]   ;;  %s3023_s4 = inlined_call_operand.vmem [shape: f32[256,4], index: 4, kind: input, shape index: {}]   ;;  %s3024_s5 = inlined_call_operand.hbm [shape: f32[8,128], index: 5, kind: output, shape index: {}]  }
   0x1   :  { %11 = vsyncpa [#allocation4], 0  ;;  %s20_s20 = sshll.u32 %s3021_s2, 4  ;;  %s2276_s21 = smov [#allocation2]   ;;  %s21_s20 = int_to_ptr.hbm [resolvable:$true] %s20_s20 }
   0x2   :  { %s22_s22 = sshll.u32 %s2276_s21, 4  ;;  %s2277_s23 = smov 128   ;;  %s23_s22 = int_to_ptr.vmem [resolvable:$true] %s22_s22 }
   0x3   :  { %s2278_s24 = smov 8  }
   0x4   :  { %28 = dma.hbm_to_vmem [thread:$0]  %s21_s20, 8192, %s23_s22, [#allocation3], %s2277_s23, %s2277_s23, %s2278_s24  }
   0x5   :  { %2272 = dma.done.wait [#allocation3], 8192  }
   0x6   :  { %2273 = vsyncadd [#allocation3], 4294959104  ;;  %v2279_v0 = vmov 0   ;;  %v2320_v1 = vld [vmem:[%s3023_s4 + $0xf0] sm:$0xff]  ;;  %v2076_v3 = vld [vmem:[%s3019_s0 + $0x18] sm:$0xff]  ;;  %vm374_vm0 = vcmask 523264  }
   0x7   :  { %2180 = vset.pattern.permute.xlu1 %v2279_v0  ;;  %2179 = vset.pattern.permute.xlu0 %v2279_v0  ;;  %v2325_v2 = vld [vmem:[%s3023_s4 + $0x70] sm:$0xff]  ;;  %v2338_v5 = vld [vmem:[%s3023_s4 + $0xe0] sm:$0xff]  ;;  %v2344_v6 = vld [vmem:[%s3023_s4 + $0xf8] sm:$0xff]  ;;  %s2282_s29 = smov 125   ;;  %s1711_s10 = sshll.u32 %s3024_s5, 4  ;;  %s1712_s10 = int_to_ptr.hbm [resolvable:$true] %s1711_s10 }
   0x8   :  { %2181 = vset.pattern.permute.xlu2 %v2279_v0  ;;  %262 = vperm.xlu0 %2179, %v2320_v1   ;;  %v2075_v4 = vld [vmem:[%s3019_s0 + $0x10] sm:$0xff]  ;;  %v2349_v7 = vld [vmem:[%s3023_s4 + $0x78] sm:$0xff]  ;;  %v2074_v8 = vld [vmem:[%s3019_s0 + $0x8] sm:$0xff] }
   0x9   :  { %182 = vperm.xlu1 %2180, %v2325_v2   ;;  %427 = vmatpush.bf16.msra.mxu0 %v2076_v3  ;;  %v2359_v9 = vld [vmem:[%s3023_s4 + $0xe8] sm:$0xff]  ;;  %v2073_v10 = vld [vmem:[%s3019_s0] sm:$0xff]  ;;  %v2084_v14 = vld [vmem:[%s3020_s1 + $0x38] sm:$0xff] }
   0xa   :  { %2158 = vmatpush.bf16.msra.mxu2 %v2076_v3  ;;  %2159 = vmatpush.bf16.msra.mxu3 %v2076_v3  ;;  %v2368_v11 = vld [vmem:[%s3023_s4 + $0x68] sm:$0xff]  ;;  %v2373_v12 = vld [vmem:[%s3023_s4 + $0x60] sm:$0xff]  ;;  %v2088_v15 = vld [vmem:[%s3020_s1 + $0x58] sm:$0xff] }
   0xb   :  { %2157 = vmatpush.bf16.msra.mxu1 %v2076_v3  ;;  %252 = vperm.xlu2 %2181, %v2338_v5   ;;  %v2077_v13 = vld [vmem:[%s3020_s1] sm:$0xff]  ;;  %v2082_v16 = vld [vmem:[%s3020_s1 + $0x28] sm:$0xff]  ;;  %v2392_v17 = vld [vmem:[%s3023_s4 + $0xd0] sm:$0xff] }
   0xc   :  { %v2402_v18 = vld [vmem:[%s3023_s4 + $0xd8] sm:$0xff]  ;;  %v2407_v19 = vld [vmem:[%s3023_s4 + $0x50] sm:$0xff]  ;;  %v2420_v21 = vld [vmem:[%s3023_s4 + $0xc0] sm:$0xff] }
   0xd   :  { %428 = vmatpush.bf16.msra.mxu0 %v2075_v4  ;;  %v2414_v20 = vld [vmem:[%s3023_s4 + $0x58] sm:$0xff]  ;;  %v2425_v22 = vld [vmem:[%s3023_s4 + $0xc8] sm:$0xff]  ;;  %v2085_v24 = vld [vmem:[%s3020_s1 + $0x40] sm:$0xff] }
   0xe   :  { %2161 = vmatpush.bf16.msra.mxu2 %v2075_v4  ;;  %2162 = vmatpush.bf16.msra.mxu3 %v2075_v4  ;;  %v2078_v23 = vld [vmem:[%s3020_s1 + $0x8] sm:$0xff]  ;;  %v2089_v25 = vld [vmem:[%s3020_s1 + $0x60] sm:$0xff]  ;;  %v2083_v26 = vld [vmem:[%s3020_s1 + $0x30] sm:$0xff] }
   0xf   :  { %2160 = vmatpush.bf16.msra.mxu1 %v2075_v4  ;;  %v2444_v27 = vld [vmem:[%s3023_s4 + $0x40] sm:$0xff]  ;;  %v2454_v28 = vld [vmem:[%s3023_s4 + $0xb0] sm:$0xff]  ;;  %v2459_v29 = vld [vmem:[%s3023_s4 + $0x48] sm:$0xff] }
  0x10   :  { %267 = vperm.xlu0 %2179, %v2344_v6   ;;  %v2466_v30 = vld [vmem:[%s3023_s4 + $0xb8] sm:$0xff]  ;;  %v2477_v32 = vld [vmem:[%s3023_s4 + $0x30] sm:$0xff]  ;;  %v2086_v34 = vld [vmem:[%s3020_s1 + $0x48] sm:$0xff] }
  0x11   :  { %187 = vperm.xlu1 %2180, %v2349_v7   ;;  %429 = vmatpush.bf16.msra.mxu0 %v2074_v8  ;;  %3031 = vst [vmem:[#allocation8_spill] sm:$0xff] %v2466_v30  ;;  %v2472_v31 = vld [vmem:[%s3023_s4 + $0x38] sm:$0xff]  ;;  %v2079_v33 = vld [vmem:[%s3020_s1 + $0x10] sm:$0xff]  ;;  %v2090_v35 = vld [vmem:[%s3020_s1 + $0x68] sm:$0xff] }
  0x12   :  { %2164 = vmatpush.bf16.msra.mxu2 %v2074_v8  ;;  %2165 = vmatpush.bf16.msra.mxu3 %v2074_v8  ;;  %v2493_v36 = vld [vmem:[%s3023_s4 + $0xa0] sm:$0xff]  ;;  %v2502_v37 = vld [vmem:[%s3023_s4 + $0xa8] sm:$0xff]  ;;  %v2520_v40 = vld [vmem:[%s3023_s4 + $0x90] sm:$0xff] }
  0x13   :  { %2163 = vmatpush.bf16.msra.mxu1 %v2074_v8  ;;  %257 = vperm.xlu2 %2181, %v2359_v9   ;;  %3032 = vst [vmem:[#allocation9_spill] sm:$0xff] %v2493_v36  ;;  %v2507_v38 = vld [vmem:[%s3023_s4 + $0x20] sm:$0xff]  ;;  %v2514_v39 = vld [vmem:[%s3023_s4 + $0x28] sm:$0xff]  ;;  %v2525_v41 = vld [vmem:[%s3023_s4 + $0x98] sm:$0xff] }
  0x14   :  { %3033 = vst [vmem:[#allocation10_spill] sm:$0xff] %v2520_v40  ;;  %v2080_v42 = vld [vmem:[%s3020_s1 + $0x18] sm:$0xff]  ;;  %v2087_v43 = vld [vmem:[%s3020_s1 + $0x50] sm:$0xff]  ;;  %v2550_v46 = vld [vmem:[%s3023_s4 + $0x80] sm:$0xff] }
  0x15   :  { %430 = vmatpush.bf16.msra.mxu0 %v2073_v10  ;;  %3034 = vst [vmem:[#allocation11_spill] sm:$0xff] %v2525_v41  ;;  %v2091_v44 = vld [vmem:[%s3020_s1 + $0x70] sm:$0xff]  ;;  %v2555_v47 = vld [vmem:[%s3023_s4 + $0x18] sm:$0xff]  ;;  %v2562_v48 = vld [vmem:[%s3023_s4 + $0x88] sm:$0xff] }
  0x16   :  { %2167 = vmatpush.bf16.msra.mxu2 %v2073_v10  ;;  %2168 = vmatpush.bf16.msra.mxu3 %v2073_v10  ;;  %v2541_v45 = vld [vmem:[%s3023_s4 + $0x10] sm:$0xff]  ;;  %3035 = vst [vmem:[#allocation12_spill] sm:$0xff] %v2550_v46  ;;  %v2568_v49 = vld [vmem:[%s3023_s4 + $0x8] sm:$0xff]  ;;  %v2573_v50 = vld [vmem:[%s3023_s4] sm:$0xff] }
  0x17   :  { %2166 = vmatpush.bf16.msra.mxu1 %v2073_v10  ;;  %3036 = vst [vmem:[#allocation13_spill] sm:$0xff] %v2562_v48  ;;  %v2081_v51 = vld [vmem:[%s3020_s1 + $0x20] sm:$0xff]  ;;  %v2092_v52 = vld [vmem:[%s3020_s1 + $0x78] sm:$0xff] }
  0x18   :  { %172 = vperm.xlu0 %2179, %v2373_v12   ;;  %1801 = vmatmul.msk.bf16.vlgmr.msra.gmra.mxu0 %vm374_vm0, %v2077_v13 }
  0x19   :  { %177 = vperm.xlu1 %2180, %v2368_v11   ;;  %1808 = vmatmul.msk.bf16.vlgmr.msra.gmra.mxu2 %vm374_vm0, %v2084_v14 }
  0x1a   :  { %1812 = vmatmul.msk.bf16.vlgmr.msra.gmra.mxu3 %vm374_vm0, %v2088_v15  ;;  %1806 = vmatmul.msk.bf16.vlgmr.msra.gmra.mxu1 %vm374_vm0, %v2082_v16 }
  0x1b   :  { %242 = vperm.xlu2 %2181, %v2392_v17  }
  0x20   :  { %247 = vperm.xlu0 %2179, %v2402_v18  }
  0x21   :  { %162 = vperm.xlu1 %2180, %v2407_v19  }
  0x23   :  { %167 = vperm.xlu2 %2181, %v2414_v20  }
  0x28   :  { %232 = vperm.xlu0 %2179, %v2420_v21   ;;  %1802 = vmatmul.msk.bf16.gmra.mxu0 %vm374_vm0, %v2078_v23 }
  0x29   :  { %237 = vperm.xlu1 %2180, %v2425_v22   ;;  %1809 = vmatmul.msk.bf16.gmra.mxu2 %vm374_vm0, %v2085_v24 }
  0x2a   :  { %1813 = vmatmul.msk.bf16.gmra.mxu3 %vm374_vm0, %v2089_v25  ;;  %1807 = vmatmul.msk.bf16.gmra.mxu1 %vm374_vm0, %v2083_v26 }
  0x2b   :  { %152 = vperm.xlu2 %2181, %v2444_v27  }
  0x30   :  { %157 = vperm.xlu0 %2179, %v2459_v29  }
  0x31   :  { %222 = vperm.xlu1 %2180, %v2454_v28  }
  0x33   :  { %227 = vperm.xlu2 %2181, %v2466_v30  }
  0x38   :  { %142 = vperm.xlu0 %2179, %v2477_v32   ;;  %1803 = vmatmul.msk.bf16.gmra.mxu0 %vm374_vm0, %v2079_v33 }
  0x39   :  { %147 = vperm.xlu1 %2180, %v2472_v31   ;;  %1810 = vmatmul.msk.bf16.gmra.mxu2 %vm374_vm0, %v2086_v34 }
  0x3a   :  { %1814 = vmatmul.msk.bf16.gmra.mxu3 %vm374_vm0, %v2090_v35 }
  0x3b   :  { %212 = vperm.xlu2 %2181, %v2493_v36  }
  0x40   :  { %217 = vperm.xlu0 %2179, %v2502_v37  }
  0x41   :  { %132 = vperm.xlu1 %2180, %v2507_v38  }
  0x43   :  { %137 = vperm.xlu2 %2181, %v2514_v39  }
  0x48   :  { %202 = vperm.xlu0 %2179, %v2520_v40   ;;  %1804 = vmatmul.msk.bf16.gmra.mxu0 %vm374_vm0, %v2080_v42 }
  0x49   :  { %207 = vperm.xlu1 %2180, %v2525_v41   ;;  %1811 = vmatmul.msk.bf16.gmra.mxu2 %vm374_vm0, %v2087_v43 }
  0x4a   :  { %1815 = vmatmul.msk.bf16.gmra.mxu3 %vm374_vm0, %v2091_v44 }
  0x4b   :  { %122 = vperm.xlu2 %2181, %v2541_v45  }
  0x50   :  { %127 = vperm.xlu0 %2179, %v2555_v47  }
  0x51   :  { %192 = vperm.xlu1 %2180, %v2550_v46   ;;  %v2280_v46 = vmov 1  }
  0x53   :  { %197 = vperm.xlu2 %2181, %v2562_v48  }
  0x58   :  { %112 = vperm.xlu0 %2179, %v2573_v50   ;;  %1805 = vmatmul.msk.bf16.gmra.mxu0 %vm374_vm0, %v2081_v51 }
  0x59   :  { %117 = vperm.xlu1 %2180, %v2568_v49  }
  0x5a   :  { %1816 = vmatmul.msk.bf16.gmra.mxu3 %vm374_vm0, %v2092_v52 }
  0x5b   :  { %2182 = vset.pattern.permute.xlu2 %v2280_v46 }
  0x5c   :  { %649 = vperm.xlu2 %2182, %v2325_v2  }
  0x60   :  { %2183 = vset.pattern.permute.xlu0 %v2280_v46 }
  0x61   :  { %2184 = vset.pattern.permute.xlu1 %v2280_v46  ;;  %653 = vperm.xlu0 %2183, %v2349_v7  }
  0x62   :  { %641 = vperm.xlu1 %2184, %v2373_v12  }
  0x64   :  { %645 = vperm.xlu2 %2182, %v2368_v11  }
  0x65   :  { %v2589_v57 = vpop.permute.xlu2 %252 }
  0x69   :  { %713 = vperm.xlu0 %2183, %v2320_v1  }
  0x6a   :  { %633 = vperm.xlu1 %2184, %v2407_v19  }
  0x6c   :  { %637 = vperm.xlu2 %2182, %v2414_v20  }
  0x6d   :  { %v2593_v62 = vpop.permute.xlu2 %257 }
  0x71   :  { %629 = vperm.xlu0 %2183, %v2459_v29  }
  0x72   :  { %717 = vperm.xlu1 %2184, %v2344_v6  }
  0x74   :  { %625 = vperm.xlu2 %2182, %v2444_v27  }
  0x75   :  { %v2601_v14 = vpop.permute.xlu2 %242 }
  0x79   :  { %617 = vperm.xlu0 %2183, %v2477_v32  }
  0x7a   :  { %v2585_v54 = vpop.permute.xlu0 %262  ;;  %705 = vperm.xlu1 %2184, %v2338_v5  }
  0x7b   :  { %v183_v53 = vpop.permute.xlu1 %182 }
  0x7c   :  { %709 = vperm.xlu2 %2182, %v2359_v9  }
  0x7d   :  { %v168_v44 = vpop.permute.xlu2 %167 }
  0x81   :  { %701 = vperm.xlu0 %2183, %v2402_v18  }
  0x82   :  { %v2587_v56 = vpop.permute.xlu0 %267  ;;  %621 = vperm.xlu1 %2184, %v2472_v31  }
  0x83   :  { %v188_v55 = vpop.permute.xlu1 %187 }
  0x84   :  { %697 = vperm.xlu2 %2182, %v2392_v17  }
  0x89   :  { %689 = vperm.xlu0 %2183, %v2420_v21  }
  0x8a   :  { %v173_v61 = vpop.permute.xlu0 %172  ;;  %609 = vperm.xlu1 %2184, %v2507_v38  }
  0x8b   :  { %v178_v59 = vpop.permute.xlu1 %177 }
  0x8c   :  { %613 = vperm.xlu2 %2182, %v2514_v39  }
  0x91   :  { %605 = vperm.xlu0 %2183, %v2555_v47  }
  0x92   :  { %v2599_v13 = vpop.permute.xlu0 %247  ;;  %693 = vperm.xlu1 %2184, %v2425_v22  }
  0x93   :  { %v163_v8 = vpop.permute.xlu1 %162 }
  0x94   :  { %601 = vperm.xlu2 %2182, %v2541_v45  }
  0x95   :  { %v2591_v58 = vpop.f32.mrf.mxu0 }
  0x97   :  { %v457_v60 = vpop.f32.mrf.mxu1 }
  0x98   :  { %v458_v52 = vadd.f32 %v457_v60, %v163_v8 }
  0x99   :  { %593 = vperm.xlu0 %2183, %v2573_v50  }
  0x9a   :  { %v2609_v42 = vpop.permute.xlu0 %232  ;;  %v522_v41 = vmax.f32 %v458_v52, 0.0  ;;  %681 = vperm.xlu1 %2184, %v2454_v28  }
  0x9b   :  { %v2607_v35 = vpop.permute.xlu1 %237 }
  0x9c   :  { %v467_v63 = vpop.f32.mrf.mxu2 }
  0x9d   :  { %v2595_v0 = vpop.f32.mrf.mxu3  ;;  %v2597_v3 = vpop.f32.mrf.mxu0  ;;  %v468_v10 = vadd.f32 %v467_v63, %v183_v53 }
  0x9f   :  { %v459_v4 = vpop.f32.mrf.mxu1  ;;  %v526_v16 = vmax.f32 %v468_v10, 0.0 }
  0xa0   :  { %v460_v53 = vadd.f32 %v459_v4, %v168_v44 }
  0xa1   :  { %677 = vperm.xlu0 %2183, %v2502_v37  }
  0xa2   :  { %v158_v36 = vpop.permute.xlu0 %157  ;;  %597 = vperm.xlu1 %2184, %v2568_v49   ;;  %v1827_v49 = vld [vmem:[#allocation2 + $0x10] sm:$0xf] }
  0xa4   :  { %v469_v15 = vpop.f32.mrf.mxu2 }
  0xa5   :  { %v470_v23 = vadd.f32 %v469_v15, %v188_v55  ;;  %v2603_v24 = vpop.f32.mrf.mxu3  ;;  %v2605_v25 = vpop.f32.mrf.mxu0 }
  0xa7   :  { %v527_v26 = vmax.f32 %v470_v23, 0.0  ;;  %v462_v33 = vpop.f32.mrf.mxu1  ;;  %v523_v23 = vmax.f32 %v460_v53, 0.0 }
  0xa8   :  { %v463_v43 = vadd.f32 %v462_v33, %v173_v61 }
  0xa9   :  { %v551_v34 = vpack.c.bf16 %v527_v26, %v526_v16  ;;  %v2615_v26 = vpop.permute.xlu1 %222  ;;  %v549_v33 = vpack.c.bf16 %v523_v23, %v522_v41 }
  0xaa   :  { %v524_v10 = vmax.f32 %v463_v43, 0.0  ;;  %v143_v8 = vpop.permute.xlu0 %142  ;;  %v488_v39 = vadd.f32 %v2595_v0, %v2615_v26 }
  0xab   :  { %880 = vmatpush.bf16.msrb.mxu1 %v551_v34 }
  0xac   :  { %v2624_v43 = vpop.f32.mrf.mxu2 }
  0xad   :  { %v2611_v51 = vpop.f32.mrf.mxu3  ;;  %v2613_v63 = vpop.f32.mrf.mxu0  ;;  %3037 = vst [vmem:[#allocation14_spill] sm:$0xff] %v2624_v43 }
  0xae   :  { %v493_v47 = vadd.f32 %v2611_v51, %v2609_v42 }
  0xaf   :  { %v464_v55 = vpop.f32.mrf.mxu1 }
  0xb0   :  { %v465_v15 = vadd.f32 %v464_v55, %v178_v59  ;;  %v153_v59 = vpop.permute.xlu2 %152  ;;  %v536_v42 = vmax.f32 %v493_v47, 0.0 }
  0xb1   :  { %v148_v4 = vpop.permute.xlu1 %147 }
  0xb2   :  { %v525_v48 = vmax.f32 %v465_v15, 0.0  ;;  %v2631_v2 = vpop.permute.xlu0 %217 }
  0xb4   :  { %v550_v16 = vpack.c.bf16 %v525_v48, %v524_v10  ;;  %v2634_v44 = vpop.f32.mrf.mxu2 }
  0xb5   :  { %v2617_v34 = vpop.f32.mrf.mxu3  ;;  %v442_v61 = vpop.f32.mrf.mxu0  ;;  %3038 = vst [vmem:[#allocation15_spill] sm:$0xff] %v2634_v44 }
  0xb6   :  { %881 = vmatpush.bf16.msrb.mxu1 %v550_v16  ;;  %v495_v22 = vadd.f32 %v2617_v34, %v2607_v35 }
  0xb8   :  { %v2629_v7 = vpop.permute.xlu2 %227  ;;  %v537_v35 = vmax.f32 %v495_v22, 0.0 }
  0xb9   :  { %v133_v46 = vpop.permute.xlu1 %132 }
  0xba   :  { %882 = vmatpush.bf16.msrb.mxu1 %v549_v33  ;;  %v2644_v53 = vpop.permute.xlu0 %202  ;;  %v556_v26 = vpack.c.bf16 %v537_v35, %v536_v42  ;;  %v2101_v35 = vld [vmem:[#allocation2 + $0x44] sm:$0xf] }
  0xbc   :  { %v2647_v6 = vpop.f32.mrf.mxu2 }
  0xbd   :  { %v2622_v48 = vpop.f32.mrf.mxu3  ;;  %v444_v60 = vpop.f32.mrf.mxu0  ;;  %v478_v45 = vadd.f32 %v2647_v6, %v2644_v53  ;;  %v3045_v53 = vld [vmem:[#allocation12_spill] sm:$0xff] }
  0xbe   :  { %657 = vperm.xlu0 %2183, %v3045_v53   ;;  %v2107_v53 = vld [vmem:[#allocation2 + $0x74] sm:$0xf] }
  0xc0   :  { %v2638_v1 = vpop.permute.xlu2 %212 }
  0xc1   :  { %v2641_v11 = vpop.permute.xlu1 %207 }
  0xc2   :  { %v128_v32 = vpop.permute.xlu0 %127 }
  0xc3   :  { %v440_v38 = vadd.f32 %v2613_v63, %v128_v32 }
  0xc4   :  { %v2654_v16 = vpop.f32.mrf.mxu2 }
  0xc5   :  { %v499_v12 = vpop.f32.mrf.mxu3  ;;  %v447_v41 = vpop.f32.mrf.mxu0  ;;  %v480_v28 = vadd.f32 %v2654_v16, %v2641_v11  ;;  %v3043_v11 = vld [vmem:[#allocation15_spill] sm:$0xff] }
  0xc6   :  { %v448_v40 = vadd.f32 %v447_v41, %v143_v8 }
  0xc8   :  { %v138_v20 = vpop.permute.xlu2 %137 }
  0xc9   :  { %v2652_v5 = vpop.permute.xlu1 %192  ;;  %v445_v31 = vadd.f32 %v444_v60, %v138_v20 }
  0xca   :  { %3039 = vst [vmem:[#allocation16_spill] sm:$0xff] %v2652_v5 }
  0xcb   :  { %v517_v41 = vmax.f32 %v445_v31, 0.0 }
  0xcd   :  { %v502_v19 = vpop.f32.mrf.mxu3  ;;  %v449_v52 = vpop.f32.mrf.mxu0 }
  0xce   :  { %v450_v27 = vadd.f32 %v449_v52, %v148_v4  ;;  %v503_v21 = vadd.f32 %v502_v19, %v2589_v57  ;;  %v498_v57 = vadd.f32 %v2622_v48, %v2601_v14  ;;  %v1819_v14 = vld [vmem:[#allocation2] sm:$0xf]  ;;  %v2094_v48 = vld [vmem:[#allocation2 + $0x4] sm:$0xf0] }
  0xcf   :  { %v1820_v51 = vor.u32 %v2094_v48, %v1819_v14  ;;  %v2104_v14 = vld [vmem:[#allocation2 + $0x54] sm:$0xf0] }
  0xd0   :  { %v519_v18 = vmax.f32 %v450_v27, 0.0  ;;  %v123_v8 = vpop.permute.xlu2 %122  ;;  %v534_v27 = vmax.f32 %v488_v39, 0.0 }
  0xd1   :  { %v438_v17 = vadd.f32 %v2605_v25, %v123_v8  ;;  %v540_v25 = vmax.f32 %v503_v21, 0.0  ;;  %v2096_v8 = vld [vmem:[#allocation2 + $0x14] sm:$0xf0]  ;;  %v3046_v21 = vld [vmem:[#allocation9_spill] sm:$0xff] }
  0xd5   :  { %v504_v55 = vpop.f32.mrf.mxu3  ;;  %v452_v29 = vpop.f32.mrf.mxu0 }
  0xd6   :  { %v453_v10 = vadd.f32 %v452_v29, %v153_v59  ;;  %v443_v59 = vadd.f32 %v442_v61, %v133_v46  ;;  %v518_v29 = vmax.f32 %v448_v40, 0.0  ;;  %v482_v61 = vpop.f32.mrf.mxu2  ;;  %v515_v46 = vmax.f32 %v440_v38, 0.0  ;;  %v3044_v38 = vld [vmem:[#allocation10_spill] sm:$0xff] }
  0xd7   :  { %665 = vperm.xlu1 %2184, %v3044_v38  }
  0xd8   :  { %v520_v44 = vmax.f32 %v453_v10, 0.0  ;;  %v547_v60 = vpack.c.bf16 %v519_v18, %v518_v29  ;;  %v516_v40 = vmax.f32 %v443_v59, 0.0  ;;  %v538_v10 = vmax.f32 %v498_v57, 0.0  ;;  %v198_v18 = vpop.permute.xlu2 %197 }
  0xd9   :  { %v531_v29 = vmax.f32 %v480_v28, 0.0  ;;  %v475_v16 = vadd.f32 %v3043_v11, %v198_v18  ;;  %v1875_v18 = vld [vmem:[#allocation2 + $0x70] sm:$0xf] }
  0xda   :  { %v546_v20 = vpack.c.bf16 %v517_v41, %v516_v40  ;;  %v3048_v40 = vld [vmem:[#allocation11_spill] sm:$0xff] }
  0xdb   :  { %v529_v6 = vmax.f32 %v475_v16, 0.0 }
  0xdd   :  { %v507_v15 = vpop.f32.mrf.mxu3  ;;  %v454_v23 = vpop.f32.mrf.mxu0 }
  0xde   :  { %v455_v33 = vadd.f32 %v454_v23, %v158_v36  ;;  %v508_v9 = vadd.f32 %v507_v15, %v2585_v54  ;;  %v505_v36 = vadd.f32 %v504_v55, %v2593_v62  ;;  %v490_v15 = vadd.f32 %v2603_v24, %v2629_v7  ;;  %v484_v32 = vpop.f32.mrf.mxu2 }
  0xdf   :  { %v485_v0 = vadd.f32 %v484_v32, %v2631_v2  ;;  %v483_v24 = vadd.f32 %v482_v61, %v2638_v1  ;;  %v3040_v2 = vld [vmem:[#allocation8_spill] sm:$0xff]  ;;  %v1835_v61 = vld [vmem:[#allocation2 + $0x20] sm:$0xf] }
  0xe0   :  { %v521_v43 = vmax.f32 %v455_v33, 0.0  ;;  %v542_v54 = vmax.f32 %v508_v9, 0.0  ;;  %v541_v62 = vmax.f32 %v505_v36, 0.0  ;;  %v535_v33 = vmax.f32 %v490_v15, 0.0  ;;  %685 = vperm.xlu2 %2182, %v3040_v2   ;;  %v3041_v1 = vld [vmem:[#allocation16_spill] sm:$0xff]  ;;  %v3042_v9 = vld [vmem:[#allocation14_spill] sm:$0xff] }
  0xe1   :  { %v533_v7 = vmax.f32 %v485_v0, 0.0  ;;  %v532_v31 = vmax.f32 %v483_v24, 0.0  ;;  %v473_v59 = vadd.f32 %v3042_v9, %v3041_v1  ;;  %v1861_v24 = vld [vmem:[#allocation2 + $0x58] sm:$0xf0]  ;;  %v2108_v1 = vld [vmem:[#allocation2 + $0x74] sm:$0xf0] }
  0xe2   :  { %v548_v30 = vpack.c.bf16 %v521_v43, %v520_v44  ;;  %v118_v43 = vpop.permute.xlu1 %117  ;;  %v113_v44 = vpop.permute.xlu0 %112  ;;  %v558_v19 = vpack.c.bf16 %v541_v62, %v540_v25  ;;  %v555_v50 = vpack.c.bf16 %v535_v33, %v534_v27  ;;  %v2097_v25 = vld [vmem:[#allocation2 + $0x24] sm:$0xf]  ;;  %v2106_v27 = vld [vmem:[#allocation2 + $0x64] sm:$0xf0]  ;;  %v1876_v9 = vor.u32 %v2108_v1, %v1875_v18 }
  0xe3   :  { %v435_v63 = vadd.f32 %v2597_v3, %v118_v43  ;;  %v433_v55 = vadd.f32 %v2591_v58, %v113_v44  ;;  %v554_v36 = vpack.c.bf16 %v533_v7, %v532_v31  ;;  %v528_v37 = vmax.f32 %v473_v59, 0.0  ;;  %v2093_v43 = vld [vmem:[#allocation2 + $0x4] sm:$0xf]  ;;  %v1821_v44 = vld [vmem:[#allocation2 + $0x8] sm:$0xf0]  ;;  %v2709_v33 = vpop.permute.xlu2 %649 }
  0xe4   :  { %883 = vmatpush.bf16.msrb.mxu1 %v548_v30  ;;  %v500_v30 = vadd.f32 %v499_v12, %v2599_v13  ;;  %v514_v13 = vmax.f32 %v438_v17, 0.0  ;;  %v3047_v17 = vld [vmem:[#allocation13_spill] sm:$0xff]  ;;  %v2105_v59 = vld [vmem:[#allocation2 + $0x64] sm:$0xf] }
  0xe5   :  { %v509_v5 = vpop.f32.mrf.mxu3  ;;  %v513_v3 = vmax.f32 %v435_v63, 0.0  ;;  %661 = vperm.xlu1 %2184, %v3047_v17  }
  0xe6   :  { %v510_v4 = vadd.f32 %v509_v5, %v2587_v56  ;;  %v539_v12 = vmax.f32 %v500_v30, 0.0  ;;  %v512_v5 = vmax.f32 %v433_v55, 0.0  ;;  %v545_v58 = vpack.c.bf16 %v515_v46, %v514_v13  ;;  %v2098_v30 = vld [vmem:[#allocation2 + $0x24] sm:$0xf0]  ;;  %v1829_v46 = vld [vmem:[#allocation2 + $0x18] sm:$0xf0] }
  0xe7   :  { %v1836_v62 = vor.u32 %v2098_v30, %v1835_v61  ;;  %v1843_v55 = vld [vmem:[#allocation2 + $0x30] sm:$0xf]  ;;  %v1837_v13 = vld [vmem:[#allocation2 + $0x28] sm:$0xf0]  ;;  %v2112_v61 = vld [vmem:[#allocation2 + $0x94] sm:$0xf0] }
  0xe8   :  { %v543_v52 = vmax.f32 %v510_v4, 0.0  ;;  %884 = vmatpush.bf16.msrb.mxu1 %v547_v60  ;;  %v557_v34 = vpack.c.bf16 %v539_v12, %v538_v10  ;;  %v544_v23 = vpack.c.bf16 %v513_v3, %v512_v5  ;;  %v530_v4 = vmax.f32 %v478_v45, 0.0  ;;  %673 = vperm.xlu2 %2182, %v3046_v21   ;;  %v1851_v12 = vld [vmem:[#allocation2 + $0x40] sm:$0xf]  ;;  %v2099_v5 = vld [vmem:[#allocation2 + $0x34] sm:$0xf] }
  0xe9   :  { %v1828_v60 = vor.u32 %v2096_v8, %v1827_v49  ;;  %v1840_v22 = vor.u32 %v2097_v25, %v1837_v13  ;;  %v1859_v10 = vld [vmem:[#allocation2 + $0x50] sm:$0xf]  ;;  %v1883_v8 = vld [vmem:[#allocation2 + $0x80] sm:$0xf] }
  0xea   :  { %v559_v56 = vpack.c.bf16 %v543_v52, %v542_v54  ;;  %v553_v41 = vpack.c.bf16 %v531_v29, %v530_v4  ;;  %v552_v54 = vpack.c.bf16 %v529_v6, %v528_v37  ;;  %v1824_v52 = vor.u32 %v2093_v43, %v1821_v44  ;;  %v2701_v48 = vpop.permute.xlu1 %641  ;;  %v2703_v39 = vpop.permute.xlu0 %653  ;;  %v1869_v29 = vld [vmem:[#allocation2 + $0x68] sm:$0xf0]  ;;  %v2110_v37 = vld [vmem:[#allocation2 + $0x84] sm:$0xf0]  ;;  %v1877_v6 = vld [vmem:[#allocation2 + $0x78] sm:$0xf0] }
  0xeb   :  { %v1860_v15 = vor.u32 %v2104_v14, %v1859_v10  ;;  %v2715_v45 = vpop.permute.xlu2 %645  ;;  %v1872_v11 = vor.u32 %v2105_v59, %v1869_v29  ;;  %v1884_v38 = vor.u32 %v2110_v37, %v1883_v8  ;;  %v1880_v44 = vor.u32 %v2107_v53, %v1877_v6  ;;  %v2111_v10 = vld [vmem:[#allocation2 + $0x94] sm:$0xf]  ;;  %v1893_v14 = vld [vmem:[#allocation2 + $0x98] sm:$0xf0]  ;;  %v1907_v59 = vld [vmem:[#allocation2 + $0xb0] sm:$0xf] }
  0xec   :  { %969 = vmatpush.bf16.msrb.mxu2 %v559_v56  ;;  %885 = vmatpush.bf16.msrb.mxu1 %v546_v20  ;;  %v2095_v56 = vld [vmem:[#allocation2 + $0x14] sm:$0xf]  ;;  %v2100_v20 = vld [vmem:[#allocation2 + $0x34] sm:$0xf0]  ;;  %v2113_v8 = vld [vmem:[#allocation2 + $0xa4] sm:$0xf] }
  0xed   :  { %v1832_v63 = vor.u32 %v2095_v56, %v1829_v46  ;;  %v1844_v57 = vor.u32 %v2100_v20, %v1843_v55  ;;  %v1885_v56 = vld [vmem:[#allocation2 + $0x88] sm:$0xf0]  ;;  %v2116_v29 = vld [vmem:[#allocation2 + $0xb4] sm:$0xf0] }
  0xee   :  { %v1901_v37 = vld [vmem:[#allocation2 + $0xa8] sm:$0xf0] }
  0xf0   :  { %970 = vmatpush.bf16.msrb.mxu2 %v558_v19  ;;  %886 = vmatpush.bf16.msrb.mxu1 %v545_v58  ;;  %v2102_v19 = vld [vmem:[#allocation2 + $0x44] sm:$0xf0]  ;;  %v1845_v58 = vld [vmem:[#allocation2 + $0x38] sm:$0xf0] }
  0xf1   :  { %669 = vperm.xlu2 %2182, %v3048_v40   ;;  %v1852_v3 = vor.u32 %v2102_v19, %v1851_v12  ;;  %v1848_v47 = vor.u32 %v2099_v5, %v1845_v58  ;;  %v1891_v40 = vld [vmem:[#allocation2 + $0x90] sm:$0xf]  ;;  %v2114_v5 = vld [vmem:[#allocation2 + $0xa4] sm:$0xf0] }
  0xf2   :  { %v2707_v42 = vpop.permute.xlu0 %713  ;;  %v1892_v30 = vor.u32 %v2112_v61, %v1891_v40 }
  0xf4   :  { %971 = vmatpush.bf16.msrb.mxu2 %v557_v34  ;;  %887 = vmatpush.bf16.msrb.mxu1 %v544_v23  ;;  %v1853_v34 = vld [vmem:[#allocation2 + $0x48] sm:$0xf0]  ;;  %v2705_v23 = vpop.permute.xlu1 %633 }
  0xf5   :  { %v1856_v32 = vor.u32 %v2101_v35, %v1853_v34 }
  0xf7   :  { %888 = vmatmul.bf16.vlgmr.msrb.gmra.mxu1 %v1820_v51  ;;  %v1867_v51 = vld [vmem:[#allocation2 + $0x60] sm:$0xf] }
  0xf8   :  { %972 = vmatpush.bf16.msrb.mxu2 %v556_v26  ;;  %v1868_v0 = vor.u32 %v2106_v27, %v1867_v51  ;;  %v2103_v26 = vld [vmem:[#allocation2 + $0x54] sm:$0xf]  ;;  %v1896_v51 = vor.u32 %v2111_v10, %v1893_v14 }
  0xfa   :  { %v2713_v7 = vpop.permute.xlu0 %629 }
  0xfc   :  { %973 = vmatpush.bf16.msrb.mxu2 %v555_v50  ;;  %v2711_v28 = vpop.permute.xlu1 %717  ;;  %v1864_v50 = vor.u32 %v2103_v26, %v1861_v24 }
 0x100   :  { %974 = vmatpush.bf16.msrb.mxu2 %v554_v36  ;;  %v2721_v36 = vpop.permute.xlu2 %637 }
 0x102   :  { %v2719_v2 = vpop.permute.xlu0 %617 }
 0x104   :  { %975 = vmatpush.bf16.msrb.mxu2 %v553_v41  ;;  %v2717_v31 = vpop.permute.xlu1 %705 }
 0x107   :  { %893 = vmatmul.bf16.gmra.mxu1 %v1828_v60 }
 0x108   :  { %976 = vmatpush.bf16.msrb.mxu2 %v552_v54  ;;  %v2727_v49 = vpop.permute.xlu2 %625 }
 0x10a   :  { %v2725_v4 = vpop.permute.xlu0 %701 }
 0x10b   :  { %977 = vmatmul.bf16.vlgmr.msrb.gmra.mxu2 %v1824_v52 }
 0x10c   :  { %v2723_v16 = vpop.permute.xlu1 %621 }
 0x110   :  { %v2733_v21 = vpop.permute.xlu2 %709 }
 0x112   :  { %v2731_v60 = vpop.permute.xlu0 %689 }
 0x114   :  { %v2729_v41 = vpop.permute.xlu1 %609 }
 0x117   :  { %898 = vmatmul.bf16.gmra.mxu1 %v1836_v62  ;;  %v2109_v62 = vld [vmem:[#allocation2 + $0x84] sm:$0xf] }
 0x118   :  { %v2737_v46 = vpop.permute.xlu2 %697  ;;  %v1888_v55 = vor.u32 %v2109_v62, %v1885_v56 }
 0x11a   :  { %v606_v17 = vpop.permute.xlu0 %605 }
 0x11b   :  { %982 = vmatmul.bf16.gmra.mxu2 %v1832_v63 }
 0x11c   :  { %v2735_v52 = vpop.permute.xlu1 %693 }
 0x120   :  { %v614_v12 = vpop.permute.xlu2 %613 }
 0x124   :  { %v2739_v20 = vpop.permute.xlu1 %681 }
 0x127   :  { %903 = vmatmul.bf16.gmra.mxu1 %v1844_v57  ;;  %v594_v57 = vpop.permute.xlu0 %593 }
 0x128   :  { %v602_v27 = vpop.permute.xlu2 %601 }
 0x12b   :  { %987 = vmatmul.bf16.gmra.mxu2 %v1840_v22 }
 0x12c   :  { %v598_v58 = vpop.permute.xlu1 %597 }
 0x137   :  { %908 = vmatmul.bf16.gmra.mxu1 %v1852_v3  ;;  %v1899_v3 = vld [vmem:[#allocation2 + $0xa0] sm:$0xf] }
 0x13b   :  { %992 = vmatmul.bf16.gmra.mxu2 %v1848_v47  ;;  %v1900_v47 = vor.u32 %v2114_v5, %v1899_v3 }
 0x147   :  { %913 = vmatmul.bf16.gmra.mxu1 %v1860_v15 }
 0x14b   :  { %997 = vmatmul.bf16.gmra.mxu2 %v1856_v32 }
 0x157   :  { %918 = vmatmul.bf16.gmra.mxu1 %v1868_v0 }
 0x15b   :  { %1002 = vmatmul.bf16.gmra.mxu2 %v1864_v50 }
 0x167   :  { %923 = vmatmul.bf16.gmra.mxu1 %v1876_v9 }
 0x16b   :  { %1007 = vmatmul.bf16.gmra.mxu2 %v1872_v11  ;;  %v1908_v11 = vor.u32 %v2116_v29, %v1907_v59 }
 0x174   :  { %v889_v43 = vpop.f32.mrf.mxu1 }
 0x175   :  { %v890_v25 = vadd.f32 %v889_v43, %v594_v57  ;;  %v2118_v57 = vld [vmem:[#allocation2 + $0xc4] sm:$0xf0] }
 0x177   :  { %928 = vmatmul.bf16.gmra.mxu1 %v1884_v38 }
 0x17b   :  { %1012 = vmatmul.bf16.gmra.mxu2 %v1880_v44  ;;  %v1904_v44 = vor.u32 %v2113_v8, %v1901_v37 }
 0x17c   :  { %v891_v54 = vpop.f32.mrf.mxu1 }
 0x17d   :  { %v892_v15 = vadd.f32 %v891_v54, %v598_v58 }
 0x184   :  { %v894_v63 = vpop.f32.mrf.mxu1 }
 0x185   :  { %v895_v24 = vadd.f32 %v894_v63, %v602_v27 }
 0x187   :  { %933 = vmatmul.bf16.gmra.mxu1 %v1892_v30 }
 0x18b   :  { %1017 = vmatmul.bf16.gmra.mxu2 %v1888_v55  ;;  %v1915_v55 = vld [vmem:[#allocation2 + $0xc0] sm:$0xf] }
 0x18c   :  { %v896_v13 = vpop.f32.mrf.mxu1 }
 0x18d   :  { %v897_v38 = vadd.f32 %v896_v13, %v606_v17  ;;  %v1909_v17 = vld [vmem:[#allocation2 + $0xb8] sm:$0xf0] }
 0x18e   :  { %v978_v22 = vpop.f32.mrf.mxu2 }
 0x18f   :  { %v979_v19 = vadd.f32 %v978_v22, %v890_v25  ;;  %v1916_v25 = vor.u32 %v2118_v57, %v1915_v55  ;;  %v2115_v22 = vld [vmem:[#allocation2 + $0xb4] sm:$0xf]  ;;  %v2121_v57 = vld [vmem:[#allocation2 + $0xe4] sm:$0xf] }
 0x190   :  { %v1912_v58 = vor.u32 %v2115_v22, %v1909_v17 }
 0x191   :  { %v1058_v0 = vmax.f32 %v979_v19, 0.0 }
 0x194   :  { %v899_v35 = vpop.f32.mrf.mxu1 }
 0x195   :  { %v900_v61 = vadd.f32 %v899_v35, %v2729_v41 }
 0x196   :  { %v980_v34 = vpop.f32.mrf.mxu2 }
 0x197   :  { %v981_v32 = vadd.f32 %v980_v34, %v892_v15  ;;  %938 = vmatmul.bf16.gmra.mxu1 %v1900_v47 }
 0x199   :  { %v1059_v26 = vmax.f32 %v981_v32, 0.0  ;;  %v1923_v32 = vld [vmem:[#allocation2 + $0xd0] sm:$0xf] }
 0x19b   :  { %1022 = vmatmul.bf16.gmra.mxu2 %v1896_v51  ;;  %v2741_v50 = vpack.c.bf16 %v1059_v26, %v1058_v0  ;;  %v2120_v51 = vld [vmem:[#allocation2 + $0xd4] sm:$0xf0]  ;;  %v1917_v0 = vld [vmem:[#allocation2 + $0xc8] sm:$0xf0] }
 0x19c   :  { %v901_v18 = vpop.f32.mrf.mxu1  ;;  %v1924_v27 = vor.u32 %v2120_v51, %v1923_v32  ;;  %v2757_v32 = vpop.permute.xlu0 %677 }
 0x19d   :  { %v902_v13 = vadd.f32 %v901_v18, %v614_v12  ;;  %v2117_v12 = vld [vmem:[#allocation2 + $0xc4] sm:$0xf] }
 0x19e   :  { %v983_v1 = vpop.f32.mrf.mxu2 }
 0x19f   :  { %v984_v9 = vadd.f32 %v983_v1, %v895_v24 }
 0x1a1   :  { %v1060_v54 = vmax.f32 %v984_v9, 0.0  ;;  %v1920_v9 = vor.u32 %v2117_v12, %v1917_v0 }
 0x1a4   :  { %v904_v53 = vpop.f32.mrf.mxu1 }
 0x1a5   :  { %v905_v41 = vadd.f32 %v904_v53, %v2719_v2  ;;  %v1931_v53 = vld [vmem:[#allocation2 + $0xe0] sm:$0xf] }
 0x1a6   :  { %v985_v6 = vpop.f32.mrf.mxu2 }
 0x1a7   :  { %v986_v43 = vadd.f32 %v985_v6, %v897_v38  ;;  %943 = vmatmul.bf16.gmra.mxu1 %v1908_v11  ;;  %v2122_v6 = vld [vmem:[#allocation2 + $0xe4] sm:$0xf0] }
 0x1a9   :  { %v1061_v40 = vmax.f32 %v986_v43, 0.0  ;;  %v1932_v43 = vor.u32 %v2122_v6, %v1931_v53 }
 0x1ab   :  { %1027 = vmatmul.bf16.gmra.mxu2 %v1904_v44  ;;  %v2744_v30 = vpack.c.bf16 %v1061_v40, %v1060_v54  ;;  %v1925_v44 = vld [vmem:[#allocation2 + $0xd8] sm:$0xf0] }
 0x1ac   :  { %v906_v62 = vpop.f32.mrf.mxu1 }
 0x1ad   :  { %v907_v26 = vadd.f32 %v906_v62, %v2723_v16  ;;  %v2119_v16 = vld [vmem:[#allocation2 + $0xd4] sm:$0xf] }
 0x1ae   :  { %v988_v56 = vpop.f32.mrf.mxu2 }
 0x1af   :  { %v989_v63 = vadd.f32 %v988_v56, %v900_v61  ;;  %v1928_v61 = vor.u32 %v2119_v16, %v1925_v44 }
 0x1b1   :  { %v1062_v47 = vmax.f32 %v989_v63, 0.0  ;;  %v2124_v63 = vld [vmem:[#allocation2 + $0xf4] sm:$0xf0] }
 0x1b4   :  { %v909_v19 = vpop.f32.mrf.mxu1 }
 0x1b5   :  { %v910_v29 = vadd.f32 %v909_v19, %v2727_v49  ;;  %v1939_v49 = vld [vmem:[#allocation2 + $0xf0] sm:$0xf] }
 0x1b6   :  { %v990_v3 = vpop.f32.mrf.mxu2  ;;  %v1940_v55 = vor.u32 %v2124_v63, %v1939_v49  ;;  %v686_v49 = vpop.permute.xlu2 %685 }
 0x1b7   :  { %v991_v5 = vadd.f32 %v990_v3, %v902_v13  ;;  %948 = vmatmul.bf16.gmra.mxu1 %v1916_v25  ;;  %v1933_v25 = vld [vmem:[#allocation2 + $0xe8] sm:$0xf0] }
 0x1b8   :  { %v1936_v13 = vor.u32 %v2121_v57, %v1933_v25 }
 0x1b9   :  { %v1063_v10 = vmax.f32 %v991_v5, 0.0  ;;  %v2123_v5 = vld [vmem:[#allocation2 + $0xf4] sm:$0xf] }
 0x1bb   :  { %1032 = vmatmul.bf16.gmra.mxu2 %v1912_v58  ;;  %v2747_v14 = vpack.c.bf16 %v1063_v10, %v1062_v47  ;;  %v1941_v58 = vld [vmem:[#allocation2 + $0xf8] sm:$0xf0] }
 0x1bc   :  { %v2749_v15 = vpop.f32.mrf.mxu1 }
 0x1be   :  { %v993_v35 = vpop.f32.mrf.mxu2 }
 0x1bf   :  { %v994_v34 = vadd.f32 %v993_v35, %v905_v41  ;;  %v1944_v41 = vor.u32 %v2123_v5, %v1941_v58 }
 0x1c1   :  { %v1064_v2 = vmax.f32 %v994_v34, 0.0 }
 0x1c4   :  { %v914_v24 = vpop.f32.mrf.mxu1 }
 0x1c6   :  { %v995_v18 = vpop.f32.mrf.mxu2 }
 0x1c7   :  { %v996_v1 = vadd.f32 %v995_v18, %v907_v26  ;;  %953 = vmatmul.bf16.gmra.mxu1 %v1924_v27 }
 0x1c9   :  { %v1065_v59 = vmax.f32 %v996_v1, 0.0 }
 0x1cb   :  { %1037 = vmatmul.bf16.gmra.mxu2 %v1920_v9  ;;  %v2753_v11 = vpack.c.bf16 %v1065_v59, %v1064_v2  ;;  %v915_v59 = vadd.f32 %v914_v24, %v2705_v23 }
 0x1cc   :  { %v916_v8 = vpop.f32.mrf.mxu1 }
 0x1cd   :  { %v917_v53 = vadd.f32 %v916_v8, %v2721_v36 }
 0x1ce   :  { %v998_v37 = vpop.f32.mrf.mxu2 }
 0x1cf   :  { %v2755_v38 = vadd.f32 %v998_v37, %v910_v29  ;;  %v666_v29 = vpop.permute.xlu1 %665  ;;  %v658_v37 = vpop.permute.xlu0 %657 }
 0x1d4   :  { %v919_v54 = vpop.f32.mrf.mxu1 }
 0x1d5   :  { %v920_v27 = vadd.f32 %v919_v54, %v2701_v48 }
 0x1d6   :  { %v1000_v40 = vpop.f32.mrf.mxu2 }
 0x1d7   :  { %958 = vmatmul.bf16.gmra.mxu1 %v1932_v43  ;;  %v662_v57 = vpop.permute.xlu1 %661 }
 0x1db   :  { %1042 = vmatmul.bf16.gmra.mxu2 %v1928_v61 }
 0x1dc   :  { %v921_v62 = vpop.f32.mrf.mxu1 }
 0x1dd   :  { %v922_v12 = vadd.f32 %v921_v62, %v2715_v45 }
 0x1de   :  { %v1003_v56 = vpop.f32.mrf.mxu2 }
 0x1df   :  { %v1004_v54 = vadd.f32 %v1003_v56, %v915_v59 }
 0x1e1   :  { %v1068_v8 = vmax.f32 %v1004_v54, 0.0 }
 0x1e4   :  { %v924_v22 = vpop.f32.mrf.mxu1 }
 0x1e5   :  { %v925_v51 = vadd.f32 %v924_v22, %v2709_v33 }
 0x1e6   :  { %v1005_v17 = vpop.f32.mrf.mxu2 }
 0x1e7   :  { %963 = vmatmul.bf16.gmra.mxu1 %v1940_v55  ;;  %v1006_v16 = vadd.f32 %v1005_v17, %v917_v53  ;;  %v1066_v17 = vmax.f32 %v2755_v38, 0.0 }
 0x1e9   :  { %v1069_v63 = vmax.f32 %v1006_v16, 0.0 }
 0x1eb   :  { %1047 = vmatmul.bf16.gmra.mxu2 %v1936_v13  ;;  %v1095_v22 = vpack.c.bf16 %v1069_v63, %v1068_v8 }
 0x1ec   :  { %v926_v19 = vpop.f32.mrf.mxu1 }
 0x1ed   :  { %v927_v0 = vadd.f32 %v926_v19, %v2703_v39  ;;  %v912_v39 = vadd.f32 %v2749_v15, %v2713_v7 }
 0x1ee   :  { %v1008_v3 = vpop.f32.mrf.mxu2 }
 0x1ef   :  { %v1009_v6 = vadd.f32 %v1008_v3, %v920_v27  ;;  %v1001_v24 = vadd.f32 %v1000_v40, %v912_v39  ;;  %v674_v3 = vpop.permute.xlu2 %673 }
 0x1f1   :  { %v1070_v61 = vmax.f32 %v1009_v6, 0.0  ;;  %v1067_v25 = vmax.f32 %v1001_v24, 0.0  ;;  %v2195_v24 = vld [vmem:[%s3023_s4 + $0xe0] sm:$0xff] }
 0x1f3   :  { %v1094_v19 = vpack.c.bf16 %v1067_v25, %v1066_v17  ;;  %v2199_v25 = vld [vmem:[%s3023_s4 + $0xd8] sm:$0xff]  ;;  %v2126_v17 = vld [vmem:[#allocation2 + $0x104] sm:$0xf0] }
 0x1f4   :  { %v929_v47 = vpop.f32.mrf.mxu1 }
 0x1f5   :  { %v930_v44 = vadd.f32 %v929_v47, %v658_v37 }
 0x1f6   :  { %v1010_v10 = vpop.f32.mrf.mxu2 }
 0x1f7   :  { %v1011_v9 = vadd.f32 %v1010_v10, %v922_v12  ;;  %v670_v38 = vpop.permute.xlu2 %669 }
 0x1f9   :  { %v1071_v48 = vmax.f32 %v1011_v9, 0.0 }
 0x1fb   :  { %1052 = vmatmul.bf16.gmra.mxu2 %v1944_v41  ;;  %v1096_v36 = vpack.c.bf16 %v1071_v48, %v1070_v61  ;;  %v2192_v48 = vld [vmem:[%s3023_s4 + $0x70] sm:$0xff] }
 0x1fc   :  { %v931_v35 = vpop.f32.mrf.mxu1 }
 0x1fd   :  { %v932_v13 = vadd.f32 %v931_v35, %v662_v57  ;;  %v2198_v57 = vld [vmem:[%s3023_s4 + $0x68] sm:$0xff] }
 0x1fe   :  { %v1013_v34 = vpop.f32.mrf.mxu2 }
 0x1ff   :  { %v1014_v26 = vadd.f32 %v1013_v34, %v925_v51 }
 0x201   :  { %v1072_v43 = vmax.f32 %v1014_v26, 0.0 }
 0x204   :  { %v934_v18 = vpop.f32.mrf.mxu1 }
 0x205   :  { %v935_v40 = vadd.f32 %v934_v18, %v666_v29 }
 0x206   :  { %v1015_v1 = vpop.f32.mrf.mxu2 }
 0x207   :  { %v1016_v2 = vadd.f32 %v1015_v1, %v927_v0 }
 0x209   :  { %v1073_v33 = vmax.f32 %v1016_v2, 0.0 }
 0x20b   :  { %v1097_v45 = vpack.c.bf16 %v1073_v33, %v1072_v43 }
 0x20c   :  { %v936_v62 = vpop.f32.mrf.mxu1 }
 0x20d   :  { %1427 = vmatpush.bf16.msrb.mxu3 %v1097_v45  ;;  %v937_v35 = vadd.f32 %v936_v62, %v670_v38  ;;  %v2128_v38 = vld [vmem:[#allocation2 + $0x114] sm:$0xf0] }
 0x20e   :  { %v1018_v23 = vpop.f32.mrf.mxu2 }
 0x20f   :  { %v1019_v55 = vadd.f32 %v1018_v23, %v930_v44  ;;  %v2194_v44 = vld [vmem:[%s3023_s4 + $0xf0] sm:$0xff] }
 0x211   :  { %1428 = vmatpush.bf16.msrb.mxu3 %v1096_v36  ;;  %v1074_v5 = vmax.f32 %v1019_v55, 0.0  ;;  %v2197_v55 = vld [vmem:[%s3023_s4 + $0x78] sm:$0xff] }
 0x214   :  { %v939_v7 = vpop.f32.mrf.mxu1 }
 0x215   :  { %1429 = vmatpush.bf16.msrb.mxu3 %v1095_v22  ;;  %v940_v18 = vadd.f32 %v939_v7, %v674_v3  ;;  %v1947_v22 = vld [vmem:[#allocation2 + $0x100] sm:$0xf] }
 0x216   :  { %v1020_v15 = vpop.f32.mrf.mxu2  ;;  %v2202_v3 = vld [vmem:[%s3023_s4 + $0xc0] sm:$0xff] }
 0x217   :  { %v1021_v56 = vadd.f32 %v1020_v15, %v932_v13  ;;  %v2200_v13 = vld [vmem:[%s3023_s4 + $0xe8] sm:$0xff]  ;;  %v1948_v15 = vor.u32 %v2126_v17, %v1947_v22 }
 0x219   :  { %v1075_v58 = vmax.f32 %v1021_v56, 0.0  ;;  %1430 = vmatpush.bf16.msrb.mxu3 %v1094_v19  ;;  %v2201_v19 = vld [vmem:[%s3023_s4 + $0x50] sm:$0xff] }
 0x21b   :  { %v2768_v47 = vpack.c.bf16 %v1075_v58, %v1074_v5  ;;  %v2203_v5 = vld [vmem:[%s3023_s4 + $0xd0] sm:$0xff] }
 0x21c   :  { %v941_v10 = vpop.f32.mrf.mxu1 }
 0x21d   :  { %1431 = vmatpush.bf16.msrb.mxu3 %v2753_v11  ;;  %v942_v59 = vadd.f32 %v941_v10, %v2757_v32  ;;  %v2193_v32 = vld [vmem:[%s3023_s4 + $0xf8] sm:$0xff]  ;;  %v2205_v10 = vld [vmem:[%s3023_s4 + $0x48] sm:$0xff] }
 0x21e   :  { %v1023_v41 = vpop.f32.mrf.mxu2 }
 0x21f   :  { %v1024_v34 = vadd.f32 %v1023_v41, %v935_v40  ;;  %v2204_v40 = vld [vmem:[%s3023_s4 + $0xc8] sm:$0xff] }
 0x221   :  { %1432 = vmatpush.bf16.msrb.mxu3 %v2747_v14  ;;  %v1076_v0 = vmax.f32 %v1024_v34, 0.0  ;;  %v1955_v34 = vld [vmem:[#allocation2 + $0x110] sm:$0xf] }
 0x224   :  { %v944_v12 = vpop.f32.mrf.mxu1 }
 0x225   :  { %1433 = vmatpush.bf16.msrb.mxu3 %v2744_v30  ;;  %v945_v30 = vadd.f32 %v944_v12, %v2739_v20  ;;  %v2207_v12 = vld [vmem:[%s3023_s4 + $0xb0] sm:$0xff] }
 0x226   :  { %v1025_v51 = vpop.f32.mrf.mxu2 }
 0x227   :  { %v1026_v27 = vadd.f32 %v1025_v51, %v937_v35  ;;  %v2206_v35 = vld [vmem:[%s3023_s4 + $0x58] sm:$0xff] }
 0x229   :  { %v1077_v26 = vmax.f32 %v1026_v27, 0.0  ;;  %1434 = vmatpush.bf16.msrb.mxu3 %v2741_v50  ;;  %v2281_v50 = vmov 2   ;;  %v1956_v27 = vor.u32 %v2128_v38, %v1955_v34 }
 0x22a   :  { %2187 = vset.pattern.permute.xlu1 %v2281_v50  ;;  %2186 = vset.pattern.permute.xlu0 %v2281_v50 }
 0x22b   :  { %v2774_v1 = vpack.c.bf16 %v1077_v26, %v1076_v0  ;;  %1196 = vperm.xlu1 %2187, %v2192_v48   ;;  %1264 = vperm.xlu0 %2186, %v2193_v32   ;;  %v2208_v0 = vld [vmem:[%s3023_s4 + $0x30] sm:$0xff]  ;;  %v2209_v26 = vld [vmem:[%s3023_s4 + $0x40] sm:$0xff] }
 0x22c   :  { %v946_v2 = vpop.f32.mrf.mxu1  ;;  %2185 = vset.pattern.permute.xlu2 %v2281_v50  ;;  %1435 = vmatmul.bf16.vlgmr.msrb.gmra.mxu3 %v1948_v15 }
 0x22d   :  { %v947_v20 = vadd.f32 %v946_v2, %v686_v49  ;;  %1260 = vperm.xlu2 %2185, %v2194_v44   ;;  %v2196_v49 = vld [vmem:[%s3023_s4 + $0x60] sm:$0xff]  ;;  %v2211_v2 = vld [vmem:[%s3023_s4 + $0xa8] sm:$0xff]  ;;  %v2217_v44 = vld [vmem:[%s3023_s4 + $0x18] sm:$0xff] }
 0x22e   :  { %v1028_v11 = vpop.f32.mrf.mxu2 }
 0x22f   :  { %v1029_v9 = vadd.f32 %v1028_v11, %v940_v18 }
 0x231   :  { %v1078_v37 = vmax.f32 %v1029_v9, 0.0  ;;  %v2210_v9 = vld [vmem:[%s3023_s4 + $0x38] sm:$0xff] }
 0x233   :  { %1252 = vperm.xlu1 %2187, %v2195_v24   ;;  %1188 = vperm.xlu0 %2186, %v2196_v49  }
 0x234   :  { %v949_v43 = vpop.f32.mrf.mxu1 }
 0x235   :  { %v950_v23 = vadd.f32 %v949_v43, %v2731_v60  ;;  %1200 = vperm.xlu2 %2185, %v2197_v55   ;;  %v2213_v43 = vld [vmem:[%s3023_s4 + $0x20] sm:$0xff] }
 0x236   :  { %v1030_v14 = vpop.f32.mrf.mxu2 }
 0x237   :  { %v1031_v29 = vadd.f32 %v1030_v14, %v942_v59  ;;  %v1963_v59 = vld [vmem:[#allocation2 + $0x120] sm:$0xf]  ;;  %v2130_v14 = vld [vmem:[#allocation2 + $0x124] sm:$0xf0] }
 0x239   :  { %v1079_v53 = vmax.f32 %v1031_v29, 0.0  ;;  %v2212_v29 = vld [vmem:[%s3023_s4 + $0xb8] sm:$0xff] }
 0x23b   :  { %v2778_v6 = vpack.c.bf16 %v1079_v53, %v1078_v37  ;;  %1192 = vperm.xlu1 %2187, %v2198_v57   ;;  %1248 = vperm.xlu0 %2186, %v2199_v25   ;;  %v1964_v53 = vor.u32 %v2130_v14, %v1963_v59  ;;  %v1995_v59 = vld [vmem:[#allocation2 + $0x160] sm:$0xf]  ;;  %v2138_v14 = vld [vmem:[#allocation2 + $0x164] sm:$0xf0] }
 0x23c   :  { %v2789_v45 = vpop.f32.mrf.mxu1  ;;  %1440 = vmatmul.bf16.gmra.mxu3 %v1956_v27 }
 0x23d   :  { %1256 = vperm.xlu2 %2185, %v2200_v13  }
 0x23e   :  { %v1033_v33 = vpop.f32.mrf.mxu2 }
 0x23f   :  { %v1034_v16 = vadd.f32 %v1033_v33, %v945_v30  ;;  %v2214_v33 = vld [vmem:[%s3023_s4 + $0x90] sm:$0xff] }
 0x241   :  { %v1080_v61 = vmax.f32 %v1034_v16, 0.0  ;;  %v2215_v16 = vld [vmem:[%s3023_s4 + $0xa0] sm:$0xff] }
 0x243   :  { %1180 = vperm.xlu1 %2187, %v2201_v19   ;;  %1236 = vperm.xlu0 %2186, %v2202_v3   ;;  %v2219_v3 = vld [vmem:[%s3023_s4 + $0x80] sm:$0xff] }
 0x244   :  { %v2805_v60 = vpop.f32.mrf.mxu1 }
 0x245   :  { %1244 = vperm.xlu2 %2185, %v2203_v5   ;;  %v955_v17 = vadd.f32 %v2805_v60, %v2737_v46  ;;  %v2221_v46 = vld [vmem:[%s3023_s4 + $0x10] sm:$0xff] }
 0x246   :  { %v1035_v39 = vpop.f32.mrf.mxu2 }
 0x247   :  { %v1036_v54 = vadd.f32 %v1035_v39, %v947_v20  ;;  %v2216_v20 = vld [vmem:[%s3023_s4 + $0x98] sm:$0xff] }
 0x249   :  { %v1081_v62 = vmax.f32 %v1036_v54, 0.0 }
 0x24b   :  { %v2798_v63 = vpack.c.bf16 %v1081_v62, %v1080_v61  ;;  %1240 = vperm.xlu1 %2187, %v2204_v40   ;;  %1176 = vperm.xlu0 %2186, %v2205_v10   ;;  %v1971_v62 = vld [vmem:[#allocation2 + $0x130] sm:$0xf] }
 0x24c   :  { %v2818_v56 = vpop.f32.mrf.mxu1  ;;  %1445 = vmatmul.bf16.gmra.mxu3 %v1964_v53  ;;  %v2140_v53 = vld [vmem:[#allocation2 + $0x174] sm:$0xf0] }
 0x24d   :  { %1184 = vperm.xlu2 %2185, %v2206_v35   ;;  %v2134_v35 = vld [vmem:[#allocation2 + $0x144] sm:$0xf0] }
 0x24e   :  { %v1038_v36 = vpop.f32.mrf.mxu2 }
 0x24f   :  { %v2803_v8 = vadd.f32 %v1038_v36, %v950_v23  ;;  %v2132_v23 = vld [vmem:[#allocation2 + $0x134] sm:$0xf0] }
 0x250   :  { %v1972_v49 = vor.u32 %v2132_v23, %v1971_v62 }
 0x253   :  { %1228 = vperm.xlu1 %2187, %v2207_v12   ;;  %1164 = vperm.xlu0 %2186, %v2208_v0   ;;  %v2125_v12 = vld [vmem:[#allocation2 + $0x104] sm:$0xf]  ;;  %v1987_v0 = vld [vmem:[#allocation2 + $0x150] sm:$0xf] }
 0x254   :  { %v959_v41 = vpop.f32.mrf.mxu1 }
 0x255   :  { %1172 = vperm.xlu2 %2185, %v2209_v26   ;;  %v960_v55 = vadd.f32 %v959_v41, %v2717_v31  ;;  %v2220_v31 = vld [vmem:[%s3023_s4] sm:$0xff]  ;;  %v2136_v26 = vld [vmem:[#allocation2 + $0x154] sm:$0xf0] }
 0x256   :  { %v2816_v7 = vpop.f32.mrf.mxu2 }
 0x25b   :  { %1168 = vperm.xlu1 %2187, %v2210_v9   ;;  %1224 = vperm.xlu0 %2186, %v2211_v2   ;;  %v2127_v9 = vld [vmem:[#allocation2 + $0x114] sm:$0xf]  ;;  %v1957_v2 = vld [vmem:[#allocation2 + $0x118] sm:$0xf0] }
 0x25c   :  { %v961_v18 = vpop.f32.mrf.mxu1  ;;  %1450 = vmatmul.bf16.gmra.mxu3 %v1972_v49  ;;  %v1981_v49 = vld [vmem:[#allocation2 + $0x148] sm:$0xf0] }
 0x25d   :  { %1232 = vperm.xlu2 %2185, %v2212_v29   ;;  %v962_v39 = vadd.f32 %v961_v18, %v2733_v21  ;;  %v957_v21 = vadd.f32 %v2818_v56, %v2725_v4  ;;  %v952_v4 = vadd.f32 %v2789_v45, %v2735_v52  ;;  %v2222_v52 = vld [vmem:[%s3023_s4 + $0x8] sm:$0xff]  ;;  %v1082_v45 = vmax.f32 %v2803_v8, 0.0 }
 0x25e   :  { %v2829_v58 = vpop.f32.mrf.mxu2  ;;  %v1949_v8 = vld [vmem:[#allocation2 + $0x108] sm:$0xf0]  ;;  %v1988_v18 = vor.u32 %v2136_v26, %v1987_v0  ;;  %v1996_v29 = vor.u32 %v2138_v14, %v1995_v59  ;;  %v2043_v59 = vld [vmem:[#allocation2 + $0x1c0] sm:$0xf]  ;;  %v2150_v14 = vld [vmem:[#allocation2 + $0x1c4] sm:$0xf0] }
 0x25f   :  { %v1044_v56 = vadd.f32 %v2829_v58, %v955_v17  ;;  %v1041_v60 = vadd.f32 %v2816_v7, %v952_v4  ;;  %v1979_v58 = vld [vmem:[#allocation2 + $0x140] sm:$0xf]  ;;  %v2223_v7 = vld [vmem:[%s3023_s4 + $0x88] sm:$0xff] }
 0x260   :  { %v2027_v4 = vld [vmem:[#allocation2 + $0x1a0] sm:$0xf] }
 0x261   :  { %v1084_v41 = vmax.f32 %v1044_v56, 0.0  ;;  %v1083_v34 = vmax.f32 %v1041_v60, 0.0  ;;  %v2146_v56 = vld [vmem:[#allocation2 + $0x1a4] sm:$0xf0] }
 0x263   :  { %1156 = vperm.xlu1 %2187, %v2213_v43   ;;  %1212 = vperm.xlu0 %2186, %v2214_v33   ;;  %v1102_v27 = vpack.c.bf16 %v1083_v34, %v1082_v45  ;;  %v1997_v45 = vld [vmem:[#allocation2 + $0x168] sm:$0xf0] }
 0x264   :  { %v964_v30 = vpop.f32.mrf.mxu1 }
 0x265   :  { %1220 = vperm.xlu2 %2185, %v2215_v16   ;;  %v965_v32 = vadd.f32 %v964_v30, %v2707_v42  ;;  %v2218_v42 = vld [vmem:[%s3023_s4 + $0x28] sm:$0xff] }
 0x266   :  { %v1045_v51 = vpop.f32.mrf.mxu2 }
 0x267   :  { %v1046_v13 = vadd.f32 %v1045_v51, %v957_v21  ;;  %v1980_v51 = vor.u32 %v2134_v35, %v1979_v58  ;;  %v2035_v35 = vld [vmem:[#allocation2 + $0x1b0] sm:$0xf] }
 0x269   :  { %v1085_v40 = vmax.f32 %v1046_v13, 0.0 }
 0x26b   :  { %1216 = vperm.xlu1 %2187, %v2216_v20   ;;  %1152 = vperm.xlu0 %2186, %v2217_v44   ;;  %v1103_v38 = vpack.c.bf16 %v1085_v40, %v1084_v41  ;;  %v2011_v20 = vld [vmem:[#allocation2 + $0x180] sm:$0xf]  ;;  %v2142_v44 = vld [vmem:[#allocation2 + $0x184] sm:$0xf0] }
 0x26c   :  { %v966_v48 = vpop.f32.mrf.mxu1  ;;  %1455 = vmatmul.bf16.gmra.mxu3 %v1980_v51 }
 0x26d   :  { %v967_v54 = vadd.f32 %v966_v48, %v2711_v28  ;;  %1160 = vperm.xlu2 %2185, %v2218_v42   ;;  %v2131_v48 = vld [vmem:[#allocation2 + $0x134] sm:$0xf] }
 0x26e   :  { %v1048_v11 = vpop.f32.mrf.mxu2 }
 0x26f   :  { %v1049_v25 = vadd.f32 %v1048_v11, %v960_v55  ;;  %v1952_v11 = vor.u32 %v2125_v12, %v1949_v8  ;;  %v2019_v55 = vld [vmem:[#allocation2 + $0x190] sm:$0xf] }
 0x271   :  { %v1086_v5 = vmax.f32 %v1049_v25, 0.0 }
 0x273   :  { %1204 = vperm.xlu1 %2187, %v2219_v3   ;;  %1140 = vperm.xlu0 %2186, %v2220_v31   ;;  %v2135_v3 = vld [vmem:[#allocation2 + $0x154] sm:$0xf]  ;;  %v1989_v31 = vld [vmem:[#allocation2 + $0x158] sm:$0xf0] }
 0x274   :  { %v1992_v60 = vor.u32 %v2135_v3, %v1989_v31 }
 0x275   :  { %1148 = vperm.xlu2 %2185, %v2221_v46  }
 0x276   :  { %v1050_v37 = vpop.f32.mrf.mxu2 }
 0x277   :  { %v1051_v36 = vadd.f32 %v1050_v37, %v962_v39  ;;  %v1965_v37 = vld [vmem:[#allocation2 + $0x128] sm:$0xf0]  ;;  %v2012_v39 = vor.u32 %v2142_v44, %v2011_v20  ;;  %v2051_v44 = vld [vmem:[#allocation2 + $0x1d0] sm:$0xf] }
 0x279   :  { %v1087_v15 = vmax.f32 %v1051_v36, 0.0  ;;  %v2144_v36 = vld [vmem:[#allocation2 + $0x194] sm:$0xf0] }
 0x27b   :  { %v1104_v10 = vpack.c.bf16 %v1087_v15, %v1086_v5  ;;  %1144 = vperm.xlu1 %2187, %v2222_v52   ;;  %v2028_v5 = vor.u32 %v2146_v56, %v2027_v4 }
 0x27c   :  { %1460 = vmatmul.bf16.gmra.mxu3 %v1988_v18 }
 0x27d   :  { %1208 = vperm.xlu2 %2185, %v2223_v7   ;;  %v2148_v7 = vld [vmem:[#allocation2 + $0x1b4] sm:$0xf0] }
 0x27e   :  { %v1053_v50 = vpop.f32.mrf.mxu2  ;;  %v2036_v51 = vor.u32 %v2148_v7, %v2035_v35  ;;  %v2021_v35 = vld [vmem:[#allocation2 + $0x198] sm:$0xf0]  ;;  %v2059_v7 = vld [vmem:[#allocation2 + $0x1e0] sm:$0xf] }
 0x27f   :  { %v1054_v61 = vadd.f32 %v1053_v50, %v965_v32  ;;  %v1973_v32 = vld [vmem:[#allocation2 + $0x138] sm:$0xf0] }
 0x281   :  { %v1088_v28 = vmax.f32 %v1054_v61, 0.0 }
 0x286   :  { %v1055_v24 = vpop.f32.mrf.mxu2 }
 0x287   :  { %v1056_v57 = vadd.f32 %v1055_v24, %v967_v54  ;;  %v1976_v54 = vor.u32 %v2131_v48, %v1973_v32  ;;  %v2916_v61 = vpop.permute.xlu2 %1260  ;;  %v2133_v24 = vld [vmem:[#allocation2 + $0x144] sm:$0xf]  ;;  %v2013_v32 = vld [vmem:[#allocation2 + $0x188] sm:$0xf0] }
 0x288   :  { %v2141_v48 = vld [vmem:[#allocation2 + $0x184] sm:$0xf] }
 0x289   :  { %v1089_v22 = vmax.f32 %v1056_v57, 0.0  ;;  %v2020_v57 = vor.u32 %v2144_v36, %v2019_v55 }
 0x28b   :  { %v1105_v19 = vpack.c.bf16 %v1089_v22, %v1088_v28  ;;  %v1984_v28 = vor.u32 %v2133_v24, %v1981_v49  ;;  %v2016_v49 = vor.u32 %v2141_v48, %v2013_v32 }
 0x28c   :  { %1465 = vmatmul.bf16.gmra.mxu3 %v1996_v29  ;;  %v2044_v29 = vor.u32 %v2150_v14, %v2043_v59 }
 0x28d   :  { %1516 = vmatpush.bf16.msrb.mxu0 %v1105_v19 }
 0x28f   :  { %v2922_v42 = vpop.permute.xlu2 %1200 }
 0x291   :  { %1517 = vmatpush.bf16.msrb.mxu0 %v1104_v10 }
 0x295   :  { %1518 = vmatpush.bf16.msrb.mxu0 %v1103_v38  ;;  %v2137_v38 = vld [vmem:[#allocation2 + $0x164] sm:$0xf] }
 0x296   :  { %v2000_v12 = vor.u32 %v2137_v38, %v1997_v45  ;;  %v2143_v45 = vld [vmem:[#allocation2 + $0x194] sm:$0xf] }
 0x297   :  { %v2928_v17 = vpop.permute.xlu2 %1256 }
 0x299   :  { %1519 = vmatpush.bf16.msrb.mxu0 %v1102_v27 }
 0x29d   :  { %1520 = vmatpush.bf16.msrb.mxu0 %v2798_v63  ;;  %v1960_v63 = vor.u32 %v2127_v9, %v1957_v2  ;;  %v2908_v33 = vpop.permute.xlu1 %1196  ;;  %v2910_v16 = vpop.permute.xlu0 %1264  ;;  %v2005_v9 = vld [vmem:[#allocation2 + $0x178] sm:$0xf0] }
 0x29f   :  { %v2934_v46 = vpop.permute.xlu2 %1244 }
 0x2a1   :  { %1521 = vmatpush.bf16.msrb.mxu0 %v2778_v6  ;;  %v2129_v6 = vld [vmem:[#allocation2 + $0x124] sm:$0xf] }
 0x2a2   :  { %v1968_v43 = vor.u32 %v2129_v6, %v1965_v37 }
 0x2a5   :  { %1522 = vmatpush.bf16.msrb.mxu0 %v2774_v1  ;;  %v2003_v1 = vld [vmem:[#allocation2 + $0x170] sm:$0xf]  ;;  %v2914_v50 = vpop.permute.xlu0 %1188 }
 0x2a6   :  { %v2004_v30 = vor.u32 %v2140_v53, %v2003_v1 }
 0x2a7   :  { %v2940_v34 = vpop.permute.xlu2 %1184 }
 0x2a8   :  { %1470 = vmatmul.bf16.gmra.mxu3 %v2004_v30 }
 0x2a9   :  { %1523 = vmatpush.bf16.msrb.mxu0 %v2768_v47  ;;  %v2912_v47 = vpop.permute.xlu1 %1252 }
 0x2ac   :  { %1524 = vmatmul.bf16.vlgmr.msrb.gmra.mxu0 %v1952_v11  ;;  %v2139_v11 = vld [vmem:[#allocation2 + $0x174] sm:$0xf] }
 0x2ad   :  { %v2920_v23 = vpop.permute.xlu0 %1248 }
 0x2af   :  { %v1436_v22 = vpop.f32.mrf.mxu3  ;;  %v2946_v8 = vpop.permute.xlu2 %1172 }
 0x2b1   :  { %v2918_v62 = vpop.permute.xlu1 %1192 }
 0x2b5   :  { %v2926_v25 = vpop.permute.xlu0 %1236 }
 0x2b7   :  { %v1438_v19 = vpop.f32.mrf.mxu3  ;;  %v2950_v2 = vpop.permute.xlu2 %1232 }
 0x2b8   :  { %1475 = vmatmul.bf16.gmra.mxu3 %v2012_v39  ;;  %v2152_v39 = vld [vmem:[#allocation2 + $0x1d4] sm:$0xf0] }
 0x2b9   :  { %v2924_v21 = vpop.permute.xlu1 %1180  ;;  %v2052_v24 = vor.u32 %v2152_v39, %v2051_v44  ;;  %v2145_v39 = vld [vmem:[#allocation2 + $0x1a4] sm:$0xf] }
 0x2bc   :  { %1529 = vmatmul.bf16.gmra.mxu0 %v1960_v63  ;;  %v2008_v63 = vor.u32 %v2139_v11, %v2005_v9  ;;  %v2024_v9 = vor.u32 %v2143_v45, %v2021_v35  ;;  %v2147_v45 = vld [vmem:[#allocation2 + $0x1b4] sm:$0xf]  ;;  %v2037_v35 = vld [vmem:[#allocation2 + $0x1b8] sm:$0xf0] }
 0x2bd   :  { %v2932_v15 = vpop.permute.xlu0 %1176 }
 0x2bf   :  { %v1441_v41 = vpop.f32.mrf.mxu3  ;;  %v2954_v53 = vpop.permute.xlu2 %1220 }
 0x2c1   :  { %v2930_v13 = vpop.permute.xlu1 %1240 }
 0x2c5   :  { %v2938_v10 = vpop.permute.xlu0 %1164 }
 0x2c7   :  { %v1443_v27 = vpop.f32.mrf.mxu3  ;;  %v1161_v36 = vpop.permute.xlu2 %1160 }
 0x2c8   :  { %1480 = vmatmul.bf16.gmra.mxu3 %v2020_v57 }
 0x2c9   :  { %v2936_v40 = vpop.permute.xlu1 %1228 }
 0x2cc   :  { %1534 = vmatmul.bf16.gmra.mxu0 %v1968_v43 }
 0x2cd   :  { %v2944_v58 = vpop.permute.xlu0 %1224 }
 0x2cf   :  { %v1446_v18 = vpop.f32.mrf.mxu3 }
 0x2d1   :  { %v2942_v52 = vpop.permute.xlu1 %1168 }
 0x2d5   :  { %v2948_v26 = vpop.permute.xlu0 %1212 }
 0x2d7   :  { %v1448_v1 = vpop.f32.mrf.mxu3 }
 0x2d8   :  { %1485 = vmatmul.bf16.gmra.mxu3 %v2028_v5  ;;  %v1149_v5 = vpop.permute.xlu2 %1148 }
 0x2d9   :  { %v1157_v0 = vpop.permute.xlu1 %1156 }
 0x2dc   :  { %1539 = vmatmul.bf16.gmra.mxu0 %v1976_v54 }
 0x2dd   :  { %v1153_v37 = vpop.permute.xlu0 %1152 }
 0x2df   :  { %v1451_v20 = vpop.f32.mrf.mxu3 }
 0x2e1   :  { %v2952_v6 = vpop.permute.xlu1 %1216 }
 0x2e5   :  { %v1141_v43 = vpop.permute.xlu0 %1140 }
 0x2e6   :  { %v1437_v54 = vadd.f32 %v1436_v22, %v1141_v43  ;;  %v1442_v22 = vadd.f32 %v1441_v41, %v1149_v5  ;;  %v2156_v41 = vld [vmem:[#allocation2 + $0x1f4] sm:$0xf0] }
 0x2e7   :  { %v1453_v3 = vpop.f32.mrf.mxu3 }
 0x2e8   :  { %1490 = vmatmul.bf16.gmra.mxu3 %v2036_v51  ;;  %v2154_v51 = vld [vmem:[#allocation2 + $0x1e4] sm:$0xf0] }
 0x2e9   :  { %v2956_v30 = vpop.permute.xlu1 %1204 }
 0x2ec   :  { %1544 = vmatmul.bf16.gmra.mxu0 %v1984_v28 }
 0x2ef   :  { %v1456_v14 = vpop.f32.mrf.mxu3 }
 0x2f1   :  { %v1145_v28 = vpop.permute.xlu1 %1144 }
 0x2f2   :  { %v1439_v31 = vadd.f32 %v1438_v19, %v1145_v28  ;;  %v1444_v19 = vadd.f32 %v1443_v27, %v1153_v37  ;;  %v1449_v37 = vadd.f32 %v1448_v1, %v1161_v36 }
 0x2f7   :  { %v2960_v48 = vpop.f32.mrf.mxu3 }
 0x2f8   :  { %1495 = vmatmul.bf16.gmra.mxu3 %v2044_v29 }
 0x2fc   :  { %1549 = vmatmul.bf16.gmra.mxu0 %v1992_v60 }
 0x2ff   :  { %v1461_v27 = vpop.f32.mrf.mxu3 }
 0x308   :  { %1500 = vmatmul.bf16.gmra.mxu3 %v2052_v24  ;;  %v2067_v24 = vld [vmem:[#allocation2 + $0x1f0] sm:$0xf] }
 0x30c   :  { %1554 = vmatmul.bf16.gmra.mxu0 %v2000_v12  ;;  %v2060_v12 = vor.u32 %v2154_v51, %v2059_v7  ;;  %v1452_v7 = vadd.f32 %v1451_v20, %v2938_v10 }
 0x318   :  { %1505 = vmatmul.bf16.gmra.mxu3 %v2060_v12 }
 0x31c   :  { %1559 = vmatmul.bf16.gmra.mxu0 %v2008_v63 }
 0x329   :  { %v1525_v55 = vpop.f32.mrf.mxu0 }
 0x32a   :  { %v1526_v57 = vadd.f32 %v1525_v55, %v1437_v54  ;;  %v2029_v54 = vld [vmem:[#allocation2 + $0x1a8] sm:$0xf0]  ;;  %v2068_v55 = vor.u32 %v2156_v41, %v2067_v24  ;;  %v2151_v41 = vld [vmem:[#allocation2 + $0x1d4] sm:$0xf] }
 0x32b   :  { %v2032_v28 = vor.u32 %v2145_v39, %v2029_v54 }
 0x32c   :  { %1564 = vmatmul.bf16.gmra.mxu0 %v2016_v49  ;;  %v1605_v60 = vmax.f32 %v1526_v57, 0.0  ;;  %v1447_v49 = vadd.f32 %v1446_v18, %v1157_v0  ;;  %1510 = vmatmul.bf16.gmra.mxu3 %v2068_v55  ;;  %v1463_v0 = vpop.f32.mrf.mxu3  ;;  %v2040_v18 = vor.u32 %v2147_v45, %v2037_v35  ;;  %v2069_v45 = vld [vmem:[#allocation2 + $0x1f8] sm:$0xf0] }
 0x331   :  { %v1527_v4 = vpop.f32.mrf.mxu0 }
 0x332   :  { %v1528_v56 = vadd.f32 %v1527_v4, %v1439_v31 }
 0x334   :  { %v1606_v38 = vmax.f32 %v1528_v56, 0.0 }
 0x336   :  { %v2958_v11 = vpack.c.bf16 %v1606_v38, %v1605_v60 }
 0x339   :  { %v1530_v59 = vpop.f32.mrf.mxu0 }
 0x33a   :  { %v1531_v29 = vadd.f32 %v1530_v59, %v1442_v22 }
 0x33c   :  { %1569 = vmatmul.bf16.gmra.mxu0 %v2024_v9  ;;  %v1607_v32 = vmax.f32 %v1531_v29, 0.0  ;;  %v1454_v9 = vadd.f32 %v1453_v3, %v2942_v52  ;;  %v1466_v29 = vpop.f32.mrf.mxu3  ;;  %v2053_v52 = vld [vmem:[#allocation2 + $0x1d8] sm:$0xf0] }
 0x341   :  { %v1532_v63 = vpop.f32.mrf.mxu0 }
 0x342   :  { %v1533_v43 = vadd.f32 %v1532_v63, %v1444_v19  ;;  %v2149_v63 = vld [vmem:[#allocation2 + $0x1c4] sm:$0xf] }
 0x344   :  { %v1608_v44 = vmax.f32 %v1533_v43, 0.0  ;;  %v2045_v43 = vld [vmem:[#allocation2 + $0x1c8] sm:$0xf0]  ;;  %v1468_v54 = vpop.f32.mrf.mxu3 }
 0x345   :  { %v2048_v10 = vor.u32 %v2149_v63, %v2045_v43  ;;  %v1462_v43 = vadd.f32 %v1461_v27, %v2924_v21 }
 0x346   :  { %v2962_v57 = vpack.c.bf16 %v1608_v44, %v1607_v32  ;;  %v1457_v32 = vadd.f32 %v1456_v14, %v2946_v8 }
 0x349   :  { %v1535_v31 = vpop.f32.mrf.mxu0 }
 0x34a   :  { %v1536_v4 = vadd.f32 %v1535_v31, %v1447_v49  ;;  %v2056_v49 = vor.u32 %v2151_v41, %v2053_v52 }
 0x34c   :  { %1574 = vmatmul.bf16.gmra.mxu0 %v2032_v28  ;;  %v1609_v60 = vmax.f32 %v1536_v4, 0.0  ;;  %v1471_v3 = vpop.f32.mrf.mxu3  ;;  %v2153_v4 = vld [vmem:[#allocation2 + $0x1e4] sm:$0xf] }
 0x351   :  { %v1537_v56 = vpop.f32.mrf.mxu0 }
 0x352   :  { %v1538_v5 = vadd.f32 %v1537_v56, %v1449_v37  ;;  %v2061_v37 = vld [vmem:[#allocation2 + $0x1e8] sm:$0xf0] }
 0x353   :  { %v2064_v8 = vor.u32 %v2153_v4, %v2061_v37  ;;  %v1209_v4 = vpop.permute.xlu2 %1208 }
 0x354   :  { %v1610_v38 = vmax.f32 %v1538_v5, 0.0  ;;  %v1473_v28 = vpop.f32.mrf.mxu3 }
 0x356   :  { %v2965_v51 = vpack.c.bf16 %v1610_v38, %v1609_v60  ;;  %v2155_v38 = vld [vmem:[#allocation2 + $0x1f4] sm:$0xf] }
 0x357   :  { %v2072_v35 = vor.u32 %v2155_v38, %v2069_v45 }
 0x359   :  { %v1540_v22 = vpop.f32.mrf.mxu0 }
 0x35a   :  { %v1541_v12 = vadd.f32 %v1540_v22, %v1452_v7 }
 0x35c   :  { %1579 = vmatmul.bf16.gmra.mxu0 %v2040_v18  ;;  %v1611_v36 = vmax.f32 %v1541_v12, 0.0  ;;  %v1476_v56 = vpop.f32.mrf.mxu3  ;;  %v1472_v18 = vadd.f32 %v1471_v3, %v2908_v33  ;;  %v1467_v12 = vadd.f32 %v1466_v29, %v2914_v50 }
 0x35d   :  { %v1477_v3 = vadd.f32 %v1476_v56, %v2956_v30 }
 0x361   :  { %v1542_v59 = vpop.f32.mrf.mxu0 }
 0x362   :  { %v1543_v1 = vadd.f32 %v1542_v59, %v1454_v9  ;;  %v1469_v9 = vadd.f32 %v1468_v54, %v2918_v62  ;;  %v1474_v59 = vadd.f32 %v1473_v28, %v2922_v42  ;;  %v1459_v62 = vadd.f32 %v2960_v48, %v2932_v15 }
 0x364   :  { %v1612_v19 = vmax.f32 %v1543_v1, 0.0  ;;  %v1478_v60 = vpop.f32.mrf.mxu3 }
 0x366   :  { %v2969_v44 = vpack.c.bf16 %v1612_v19, %v1611_v36 }
 0x369   :  { %v1545_v20 = vpop.f32.mrf.mxu0 }
 0x36a   :  { %v2971_v39 = vadd.f32 %v1545_v20, %v1457_v32  ;;  %v1464_v32 = vadd.f32 %v1463_v0, %v2940_v34 }
 0x36c   :  { %1584 = vmatmul.bf16.gmra.mxu0 %v2048_v10  ;;  %v1481_v22 = vpop.f32.mrf.mxu3  ;;  %v1613_v30 = vmax.f32 %v2971_v39, 0.0 }
 0x371   :  { %v1547_v24 = vpop.f32.mrf.mxu0 }
 0x372   :  { %v1548_v28 = vadd.f32 %v1547_v24, %v1459_v62  ;;  %v1482_v24 = vadd.f32 %v1481_v22, %v2948_v26 }
 0x374   :  { %v1483_v29 = vpop.f32.mrf.mxu3 }
 0x375   :  { %v1484_v39 = vadd.f32 %v1483_v29, %v2952_v6 }
 0x379   :  { %v1550_v55 = vpop.f32.mrf.mxu0 }
 0x37a   :  { %v1551_v42 = vadd.f32 %v1550_v55, %v1462_v43 }
 0x37c   :  { %1589 = vmatmul.bf16.gmra.mxu0 %v2056_v49  ;;  %v1615_v0 = vmax.f32 %v1551_v42, 0.0  ;;  %v1486_v56 = vpop.f32.mrf.mxu3 }
 0x37d   :  { %v1487_v22 = vadd.f32 %v1486_v56, %v2954_v53 }
 0x381   :  { %v1552_v31 = vpop.f32.mrf.mxu0 }
 0x382   :  { %v1553_v33 = vadd.f32 %v1552_v31, %v1464_v32  ;;  %v1614_v31 = vmax.f32 %v1548_v28, 0.0 }
 0x384   :  { %v1616_v21 = vmax.f32 %v1553_v33, 0.0  ;;  %v1641_v15 = vpack.c.bf16 %v1614_v31, %v1613_v30 }
 0x386   :  { %v1642_v37 = vpack.c.bf16 %v1616_v21, %v1615_v0 }
 0x389   :  { %v1555_v14 = vpop.f32.mrf.mxu0 }
 0x38a   :  { %v1556_v10 = vadd.f32 %v1555_v14, %v1467_v12 }
 0x38c   :  { %1594 = vmatmul.bf16.gmra.mxu0 %v2064_v8  ;;  %v1617_v54 = vmax.f32 %v1556_v10, 0.0  ;;  %v1479_v8 = vadd.f32 %v1478_v60, %v1209_v4 }
 0x391   :  { %v1557_v5 = vpop.f32.mrf.mxu0 }
 0x392   :  { %v1558_v19 = vadd.f32 %v1557_v5, %v1469_v9 }
 0x394   :  { %v1618_v52 = vmax.f32 %v1558_v19, 0.0 }
 0x396   :  { %v1643_v27 = vpack.c.bf16 %v1618_v52, %v1617_v54 }
 0x399   :  { %v1560_v7 = vpop.f32.mrf.mxu0 }
 0x39a   :  { %v1561_v1 = vadd.f32 %v1560_v7, %v1472_v18  ;;  %v1488_v7 = vpop.f32.mrf.mxu3 }
 0x39c   :  { %1599 = vmatmul.bf16.gmra.mxu0 %v2072_v35  ;;  %v1619_v20 = vmax.f32 %v1561_v1, 0.0 }
 0x3a1   :  { %v1562_v36 = vpop.f32.mrf.mxu0 }
 0x3a2   :  { %v1563_v63 = vadd.f32 %v1562_v36, %v1474_v59  ;;  %v1491_v26 = vpop.f32.mrf.mxu3 }
 0x3a3   :  { %v1492_v43 = vadd.f32 %v1491_v26, %v2936_v40 }
 0x3a4   :  { %v1620_v41 = vmax.f32 %v1563_v63, 0.0 }
 0x3a6   :  { %v1644_v50 = vpack.c.bf16 %v1620_v41, %v1619_v20 }
 0x3a8   :  { %1668 = vmatpush.bf16.msra.mxu1 %v1644_v50 }
 0x3a9   :  { %v1565_v49 = vpop.f32.mrf.mxu0 }
 0x3aa   :  { %v1566_v34 = vadd.f32 %v1565_v49, %v1477_v3  ;;  %v1493_v36 = vpop.f32.mrf.mxu3 }
 0x3ab   :  { %v1494_v53 = vadd.f32 %v1493_v36, %v2950_v2 }
 0x3ac   :  { %1669 = vmatpush.bf16.msra.mxu1 %v1643_v27  ;;  %v1621_v55 = vmax.f32 %v1566_v34, 0.0 }
 0x3b0   :  { %1670 = vmatpush.bf16.msra.mxu1 %v1642_v37  ;;  %v1654_v37 = vld [vmem:[%s3023_s4] sm:$0x1]  ;;  %s2283_s4 = smov [#allocation5]  }
 0x3b1   :  { %v1567_v14 = vpop.f32.mrf.mxu0  ;;  %1656 = vrot.lane.b32.xlu2 %v1654_v37, %s2282_s29  ;;  %s1709_s7 = sshll.u32 %s2283_s4, 4  ;;  %s1710_s7 = int_to_ptr.vmem [resolvable:$true] %s1709_s7 }
 0x3b2   :  { %v1568_v48 = vadd.f32 %v1567_v14, %v1479_v8  ;;  %v1653_v8 = vld [vmem:[%s3022_s3] sm:$0xff] }
 0x3b3   :  { %v1662_v14 = vunpack.c.l.b16 %v1653_v8 }
 0x3b4   :  { %v1622_v5 = vmax.f32 %v1568_v48, 0.0  ;;  %1671 = vmatpush.bf16.msra.mxu1 %v1641_v15 }
 0x3b6   :  { %v2984_v38 = vpack.c.bf16 %v1622_v5, %v1621_v55  ;;  %v1664_v5 = vpack.c.b16 %v1662_v14, %v1662_v14 }
 0x3b8   :  { %1672 = vmatpush.bf16.msra.mxu1 %v2969_v44 }
 0x3b9   :  { %v1570_v45 = vpop.f32.mrf.mxu0 }
 0x3ba   :  { %v1571_v35 = vadd.f32 %v1570_v45, %v1482_v24 }
 0x3bc   :  { %1673 = vmatpush.bf16.msra.mxu1 %v2965_v51  ;;  %v1623_v12 = vmax.f32 %v1571_v35, 0.0  ;;  %v1489_v51 = vadd.f32 %v1488_v7, %v2944_v58 }
 0x3c0   :  { %1674 = vmatpush.bf16.msra.mxu1 %v2962_v57 }
 0x3c1   :  { %v1572_v60 = vpop.f32.mrf.mxu0 }
 0x3c2   :  { %v1573_v18 = vadd.f32 %v1572_v60, %v1484_v39 }
 0x3c4   :  { %v1624_v9 = vmax.f32 %v1573_v18, 0.0  ;;  %1675 = vmatpush.bf16.msra.mxu1 %v2958_v11  ;;  %v1496_v11 = vpop.f32.mrf.mxu3 }
 0x3c5   :  { %v1497_v58 = vadd.f32 %v1496_v11, %v2926_v25 }
 0x3c6   :  { %v2992_v59 = vpack.c.bf16 %v1624_v9, %v1623_v12 }
 0x3c7   :  { %1676 = vmatmul.bf16.vlgmr.msra.gmra.mxu1 %v1664_v5 }
 0x3c9   :  { %v1575_v44 = vpop.f32.mrf.mxu0 }
 0x3ca   :  { %v1576_v1 = vadd.f32 %v1575_v44, %v1487_v22 }
 0x3cc   :  { %v1625_v63 = vmax.f32 %v1576_v1, 0.0  ;;  %v1498_v52 = vpop.f32.mrf.mxu3 }
 0x3d1   :  { %v1577_v19 = vpop.f32.mrf.mxu0 }
 0x3d2   :  { %v1578_v6 = vadd.f32 %v1577_v19, %v1489_v51 }
 0x3d4   :  { %v1626_v57 = vmax.f32 %v1578_v6, 0.0  ;;  %v1501_v54 = vpop.f32.mrf.mxu3 }
 0x3d5   :  { %v1502_v18 = vadd.f32 %v1501_v54, %v2934_v46  ;;  %v1663_v46 = vunpack.c.h.b16 %v1653_v8 }
 0x3d6   :  { %v2996_v32 = vpack.c.bf16 %v1626_v57, %v1625_v63 }
 0x3d9   :  { %v1580_v10 = vpop.f32.mrf.mxu0 }
 0x3da   :  { %v1581_v20 = vadd.f32 %v1580_v10, %v1492_v43 }
 0x3dc   :  { %v1627_v3 = vmax.f32 %v1581_v20, 0.0  ;;  %v1503_v40 = vpop.f32.mrf.mxu3 }
 0x3dd   :  { %v1504_v7 = vadd.f32 %v1503_v40, %v2920_v23 }
 0x3e1   :  { %v1582_v41 = vpop.f32.mrf.mxu0 }
 0x3e2   :  { %v1583_v33 = vadd.f32 %v1582_v41, %v1494_v53 }
 0x3e4   :  { %v1628_v50 = vmax.f32 %v1583_v33, 0.0  ;;  %v1506_v21 = vpop.f32.mrf.mxu3 }
 0x3e5   :  { %v1507_v24 = vadd.f32 %v1506_v21, %v2912_v47 }
 0x3e6   :  { %v1648_v29 = vpack.c.bf16 %v1628_v50, %v1627_v3 }
 0x3e9   :  { %v1585_v62 = vpop.f32.mrf.mxu0 }
 0x3ea   :  { %v1586_v42 = vadd.f32 %v1585_v62, %v1497_v58 }
 0x3ec   :  { %v1508_v0 = vpop.f32.mrf.mxu3  ;;  %v1629_v19 = vmax.f32 %v1586_v42, 0.0 }
 0x3ed   :  { %v1509_v56 = vadd.f32 %v1508_v0, %v2928_v17 }
 0x3f1   :  { %v1587_v49 = vpop.f32.mrf.mxu0 }
 0x3f4   :  { %v1511_v2 = vpop.f32.mrf.mxu3 }
 0x3f5   :  { %v1512_v30 = vadd.f32 %v1511_v2, %v2916_v61 }
 0x3f9   :  { %v1590_v28 = vpop.f32.mrf.mxu0 }
 0x3fa   :  { %v1591_v26 = vadd.f32 %v1590_v28, %v1502_v18 }
 0x3fc   :  { %v1513_v25 = vpop.f32.mrf.mxu3  ;;  %v1631_v36 = vmax.f32 %v1591_v26, 0.0 }
 0x3fd   :  { %v1514_v15 = vadd.f32 %v1513_v25, %v2910_v16  ;;  %v1499_v16 = vadd.f32 %v1498_v52, %v2930_v13  ;;  %v1665_v13 = vpack.c.b16 %v1663_v46, %v1663_v46 }
 0x3ff   :  { %v1588_v44 = vadd.f32 %v1587_v49, %v1499_v16 }
 0x401   :  { %v1592_v27 = vpop.f32.mrf.mxu0  ;;  %v1630_v51 = vmax.f32 %v1588_v44, 0.0 }
 0x402   :  { %v1593_v12 = vadd.f32 %v1592_v27, %v1504_v7 }
 0x403   :  { %v1649_v6 = vpack.c.bf16 %v1630_v51, %v1629_v19 }
 0x404   :  { %v1632_v47 = vmax.f32 %v1593_v12, 0.0 }
 0x406   :  { %v1650_v23 = vpack.c.bf16 %v1632_v47, %v1631_v36 }
 0x409   :  { %v1595_v34 = vpop.f32.mrf.mxu0 }
 0x40a   :  { %v1596_v61 = vadd.f32 %v1595_v34, %v1507_v24 }
 0x40b   :  { %v1657_v63 = vpop.permute.xlu2 %1656 }
 0x40c   :  { %v1633_v22 = vmax.f32 %v1596_v61, 0.0  ;;  %2169 = vpush %v1657_v63 }
 0x411   :  { %v1597_v4 = vpop.f32.mrf.mxu0 }
 0x412   :  { %v1598_v45 = vadd.f32 %v1597_v4, %v1509_v56 }
 0x414   :  { %v1634_v9 = vmax.f32 %v1598_v45, 0.0 }
 0x416   :  { %v1651_v1 = vpack.c.bf16 %v1634_v9, %v1633_v22 }
 0x419   :  { %v1600_v31 = vpop.f32.mrf.mxu0 }
 0x41a   :  { %v1601_v48 = vadd.f32 %v1600_v31, %v1512_v30 }
 0x41c   :  { %v1635_v39 = vmax.f32 %v1601_v48, 0.0 }
 0x421   :  { %v1602_v55 = vpop.f32.mrf.mxu0 }
 0x422   :  { %v1603_v35 = vadd.f32 %v1602_v55, %v1514_v15 }
 0x424   :  { %v1636_v60 = vmax.f32 %v1603_v35, 0.0 }
 0x426   :  { %v1652_v17 = vpack.c.bf16 %v1636_v60, %v1635_v39 }
 0x428   :  { %1681 = vmatpush.bf16.msra.mxu2 %v1652_v17 }
 0x42c   :  { %1682 = vmatpush.bf16.msra.mxu2 %v1651_v1 }
 0x430   :  { %1683 = vmatpush.bf16.msra.mxu2 %v1650_v23 }
 0x434   :  { %1684 = vmatpush.bf16.msra.mxu2 %v1649_v6 }
 0x438   :  { %1685 = vmatpush.bf16.msra.mxu2 %v1648_v29 }
 0x43c   :  { %1686 = vmatpush.bf16.msra.mxu2 %v2996_v32 }
 0x43d   :  { %s2170_s3 = spop %2169 }
 0x43e   :  { %v1659_v10 = vstv %s2170_s3 }
 0x440   :  { %1687 = vmatpush.bf16.msra.mxu2 %v2992_v59 }
 0x444   :  { %1688 = vmatpush.bf16.msra.mxu2 %v2984_v38  ;;  %v1677_v57 = vpop.f32.mrf.mxu1 }
 0x445   :  { %v1678_v11 = vadd.f32 %v1677_v57, %v1659_v10 }
 0x447   :  { %1689 = vmatmul.bf16.vlgmr.msra.gmra.mxu2 %v1665_v13 }
 0x44c   :  { %v1679_v43 = vpop.f32.mrf.mxu1 }
 0x4ca   :  { %v1690_v20 = vpop.f32.mrf.mxu2 }
 0x4cb   :  { %v1691_v53 = vadd.f32 %v1690_v20, %v1678_v11 }
 0x4cd   :  { %v1694_v41 = vand.u32 2147483647, %v1691_v53  ;;  %vm1700_vm1 = vcmp.ge.f32.partialorder %v1691_v53, 0.0 }
 0x4cf   :  { %v1695_v33 = vsub.f32 0.0, %v1694_v41 }
 0x4d1   :  { %v1696_v52 = vmul.f32 1.442695, %v1695_v33 }
 0x4d2   :  { %v1692_v32 = vpop.f32.mrf.mxu2 }
 0x4d3   :  { %2188 = vpow2.f32 %v1696_v52 }
 0x4d9   :  { %v2189_v3 = vpop.eup %2188 }
 0x4da   :  { %v1698_v59 = vadd.f32 1.0, %v2189_v3 }
 0x4dc   :  { %2190 = vrcp.f32 %v1698_v59 }
 0x4e2   :  { %v2191_v38 = vpop.eup %2190 }
 0x4e3   :  { %v1701_v50 = vmul.f32 %v2191_v38, %v2189_v3 }
 0x4e5   :  { %v1702_v58 = vsel %vm1700_vm1, %v2191_v38, %v1701_v50 }
 0x4e6   :  { %1703 = vst [vmem:[#allocation5] sm:$0xff] %v1702_v58 }
 0x4e7   :  { %1714 = dma.vmem_to_hbm [thread:$0]  %s1710_s7, 128, %s1712_s10, [#allocation4]  }
 0x4e8   :  { %2274 = dma.done.wait [#allocation4], 128  }
 0x4e9   :  { %2275 = vsyncadd [#allocation4], 4294967168 }
 0x4ea   :  { %1719 = vsyncpa [#allocation3], 1 }
 0x4eb   :  { %1720 = vsyncpa [#allocation4], 1 }

</bundles_post_ra>
